<compile_context>
chip_gen: v7x
topology: tpu7x:2x2x1
jax: 0.10.0
libtpu: 0.0.40
codegen_flags: <defaults>
</compile_context>

<pallas_src>
import functools

import jax
import jax.numpy as jnp
from jax import lax
from jax.experimental import pallas as pl
from jax.experimental.pallas import tpu as pltpu


OUT_PAD = 128   # lane-dense packed output width: [abundances | reconstruction | zeros]


# ---------------------------------------------------------------------------
# In-kernel helpers
# ---------------------------------------------------------------------------
def _epilogue(x, ep):
    """conv bias -> LeakyReLU(0.02) -> BatchNorm2d(eval) fold. ep rows = [bias, scale, shift]."""
    y = x + ep[0:1, :]
    y = jnp.where(y >= 0.0, y, 0.02 * y)
    return y * ep[1:2, :] + ep[2:3, :]


def _conv3x3(xflat, w_ref, Hs, Ws, Cin):
    """3x3 'same' conv on a flattened (Hs*Ws, Cin) bf16 feature map.

    Weight ref layout: (9*Cin, Cout) with row index ((ky*3 + kx)*Cin + ci) (HWIO flat).
    Implemented as 3 dots (one per ky) with an (Hs*Ws, 3*Cin) LHS so the MXU always sees
    M = Hs*Ws rows.  Halo is handled with zero masks (x boundary) and zero row bands
    (y boundary) -- no padding buffers.  Returns an f32 (Hs*Ws, Cout) accumulator
    (bias/activation applied by the caller).
    """
    M = Hs * Ws
    dt = xflat.dtype
    z_row = jnp.zeros((1, Cin), dt)
    col = lax.broadcasted_iota(jnp.int32, (M, 1), 0) % Ws
    not_first = (col != 0).astype(dt)
    not_last = (col != Ws - 1).astype(dt)
    xm = jnp.concatenate([z_row, xflat[:M - 1]], axis=0) * not_first   # in[y, x-1]
    xp = jnp.concatenate([xflat[1:], z_row], axis=0) * not_last        # in[y, x+1]
    x3 = jnp.concatenate([xm, xflat, xp], axis=1)                      # (M, 3*Cin): kx=0,1,2
    z_band = jnp.zeros((Ws, 3 * Cin), dt)
    acc = None
    for ky in range(3):
        if ky == 0:
            lhs = jnp.concatenate([z_band, x3[:M - Ws]], axis=0)       # reads in[y-1, :]
        elif ky == 1:
            lhs = x3
        else:
            lhs = jnp.concatenate([x3[Ws:], z_band], axis=0)           # reads in[y+1, :]
        part = jnp.dot(lhs, w_ref[ky * 3 * Cin:(ky + 1) * 3 * Cin, :],
                       preferred_element_type=jnp.float32)
        acc = part if acc is None else acc + part
    return acc


# ---------------------------------------------------------------------------
# The single fused kernel (one grid step = one batch element).
# ---------------------------------------------------------------------------
def _hypersigma_kernel(gap_ref, patches_ref, wspec_ref, wfc1_ref, wfc2_ref,
                       wemb_ref, wstg_ref, wcf_ref, r_ref,
                       wfpn_ref, epfpn_ref, wsm1_ref, epsm1_ref,
                       wsm2_ref, bsm2_ref, wc5_ref, epc5_ref, wdec_ref,
                       out_ref, *, Hp, Wp, H, W, NT, P, C, sum_scale):
    f32, bf16 = jnp.float32, jnp.bfloat16

    # ---- spectral branch (SpecViT stand-in): GAP tokens -> 4x fc_spec -> (1 + sigmoid)
    g = gap_ref[0]                                                     # (8, C), rows identical
    tok = jnp.maximum(jnp.dot(g, wspec_ref[...], preferred_element_type=f32), 0.0)
    hsp = jnp.maximum(jnp.dot(tok.astype(bf16), wfc1_ref[...],
                              preferred_element_type=f32), 0.0)
    logits = jnp.dot(hsp.astype(bf16), wfc2_ref[...], preferred_element_type=f32)
    scale = 1.0 + 1.0 / (1.0 + jnp.exp(-logits[0:1, :]))               # exact sigmoid, (1, 4*NT)

    # ---- spatial encoder (SpatViT stand-in) + block-diag conv_features + spectral fusion
    e = jnp.dot(patches_ref[0], wemb_ref[...], preferred_element_type=f32)
    feats = []
    for i in range(4):
        e = jnp.maximum(jnp.dot(e.astype(bf16), wstg_ref[i],
                                preferred_element_type=f32), 0.0)
        feats.append(e)
    fcat = jnp.concatenate(feats, axis=-1).astype(bf16)                # (Hp*Wp, 4*E)
    ss = scale * jnp.dot(fcat, wcf_ref[...], preferred_element_type=f32)   # (Hp*Wp, 4*NT)

    # ---- conv1..conv4 merged block-structured 3x3 (+bias+LeakyReLU+BN) at low resolution
    pc = _conv3x3(ss.astype(bf16), wfpn_ref, Hp, Wp, 4 * NT)
    pc = _epilogue(pc, epfpn_ref[...])                                 # (Hp*Wp, 4*NT)

    # ---- bilinear up-sample (align_corners=True) as one matmul (K = Hp*Wp)
    up = jnp.dot(r_ref[...], pc.astype(bf16), preferred_element_type=f32)  # (H*W, 4*NT)

    # ---- smooth 3x3 (+bias+LeakyReLU+BN)
    s1 = _conv3x3(up.astype(bf16), wsm1_ref, H, W, 4 * NT)
    s1 = _epilogue(s1, epsm1_ref[...])                                 # (H*W, 2*NT)

    # ---- smooth final 1x1 -> conv5 (+leaky+BN) -> SumToOne softmax -> decoder
    h2 = jnp.dot(s1.astype(bf16), wsm2_ref[...],
                 preferred_element_type=f32) + bsm2_ref[...]           # (H*W, NT)
    y = jnp.dot(h2.astype(bf16), wc5_ref[...], preferred_element_type=f32)
    y = _epilogue(y, epc5_ref[...])                                    # (H*W, P)
    z = sum_scale * y
    z = z - jnp.max(z, axis=-1, keepdims=True)
    ez = jnp.exp(z)
    a = ez / jnp.sum(ez, axis=-1, keepdims=True)                       # exact softmax (sum == 1)
    recon = jnp.dot(a, wdec_ref[...], preferred_element_type=f32)      # decoder in f32 (K = P)

    # ---- lane-dense packed store: [abundances | reconstruction | zero pad]
    pieces = [a, recon]
    if OUT_PAD - P - C > 0:
        pieces.append(jnp.zeros((H * W, OUT_PAD - P - C), f32))
    out_ref[0] = jnp.concatenate(pieces, axis=-1)


def fused_forward(gap8, patches, fp, cfg):
    B = gap8.shape[0]
    C, NT, E = cfg["channels"], cfg["NUM_TOKENS"], cfg["embed_dim"]
    P, seg = cfg["num_em"], cfg["seg_patches"]
    H = W = cfg["patch_size"]
    Hp, Wp = H // seg, W // seg
    M, K = Hp * Wp, seg * seg * C
    H1 = fp["w_fc1"].shape[1]

    kernel = functools.partial(_hypersigma_kernel, Hp=Hp, Wp=Wp, H=H, W=W,
                               NT=NT, P=P, C=C, sum_scale=float(cfg["scale"]))
    return pl.pallas_call(
        kernel,
        out_shape=jax.ShapeDtypeStruct((B, H * W, OUT_PAD), jnp.float32),
        grid=(B,),
        in_specs=[
            pl.BlockSpec((1, 8, C), lambda b: (b, 0, 0)),              # gap (row-replicated)
            pl.BlockSpec((1, M, K), lambda b: (b, 0, 0)),              # patches
            pl.BlockSpec((C, NT), lambda b: (0, 0)),                   # w_spec
            pl.BlockSpec((NT, H1), lambda b: (0, 0)),                  # w_fc1 (4 MLPs batched)
            pl.BlockSpec((H1, 4 * NT), lambda b: (0, 0)),              # w_fc2 (block-diag)
            pl.BlockSpec((K, E), lambda b: (0, 0)),                    # w_embed
            pl.BlockSpec((4, E, E), lambda b: (0, 0, 0)),              # w_stage (stacked)
            pl.BlockSpec((4 * E, 4 * NT), lambda b: (0, 0)),           # w_cf (block-diag)
            pl.BlockSpec((H * W, M), lambda b: (0, 0)),                # R (bilinear upsample)
            pl.BlockSpec((9 * 4 * NT, 4 * NT), lambda b: (0, 0)),      # w_fpn (merged conv1..4)
            pl.BlockSpec((3, 4 * NT), lambda b: (0, 0)),               # ep_fpn
            pl.BlockSpec((9 * 4 * NT, 2 * NT), lambda b: (0, 0)),      # w_sm1 (smooth 3x3)
            pl.BlockSpec((3, 2 * NT), lambda b: (0, 0)),               # ep_sm1
            pl.BlockSpec((2 * NT, NT), lambda b: (0, 0)),              # w_sm2 (smooth 1x1)
            pl.BlockSpec((1, NT), lambda b: (0, 0)),                   # b_sm2
            pl.BlockSpec((NT, P), lambda b: (0, 0)),                   # w_c5
            pl.BlockSpec((3, P), lambda b: (0, 0)),                    # ep_c5
            pl.BlockSpec((P, C), lambda b: (0, 0)),                    # w_dec (f32)
        ],
        out_specs=pl.BlockSpec((1, H * W, OUT_PAD), lambda b: (b, 0, 0)),
        compiler_params=pltpu.CompilerParams(dimension_semantics=("parallel",)),
    )(gap8, patches, fp["w_spec"], fp["w_fc1"], fp["w_fc2"], fp["w_embed"],
      fp["w_stage"], fp["w_cf"], fp["R"], fp["w_fpn"], fp["ep_fpn"],
      fp["w_sm1"], fp["ep_sm1"], fp["w_sm2"], fp["b_sm2"],
      fp["w_c5"], fp["ep_c5"], fp["w_dec"])


# ---------------------------------------------------------------------------
# Bilinear (align_corners=True) interpolation matrices (built once at pack time).
# ---------------------------------------------------------------------------
def _interp_matrix(n_out, n_in):
    if n_in == 1:
        return jnp.ones((n_out, 1), jnp.float32)
    s = jnp.arange(n_out, dtype=jnp.float32) * (n_in - 1) / max(n_out - 1, 1)
    i0 = jnp.clip(jnp.floor(s).astype(jnp.int32), 0, n_in - 2)
    frac = s - i0.astype(jnp.float32)
    rows = jnp.arange(n_out)
    R = jnp.zeros((n_out, n_in), jnp.float32)
    R = R.at[rows, i0].add(1.0 - frac)
    R = R.at[rows, i0 + 1].add(frac)
    return R


# ---------------------------------------------------------------------------
# Deterministic parameter construction.
# ---------------------------------------------------------------------------
class ParamGen:
    def __init__(self, seed=0):
        self.key = jax.random.PRNGKey(seed)
        self.count = 0

    def __call__(self, shape, std=0.1):
        self.count += 1
        return std * jax.random.normal(jax.random.fold_in(self.key, self.count),
                                       shape, jnp.float32)


def make_bn(pg, C, eps=1e-5):
    # BatchNorm2d (eval mode) folded into per-channel (scale, shift).
    gamma = 1.0 + pg((C,), 0.05)
    beta = pg((C,), 0.05)
    mean = pg((C,), 0.05)
    var = 1.0 + jnp.abs(pg((C,), 0.05))
    scale = gamma / jnp.sqrt(var + eps)
    shift = beta - mean * scale
    return scale, shift


def init_params(cfg):
    pg = ParamGen(0)
    C, E, NT = cfg["channels"], cfg["embed_dim"], cfg["NUM_TOKENS"]
    seg, P = cfg["seg_patches"], cfg["num_em"]
    p = {}
    # TODO(synk): SpatViT / SpecViT (12-layer ViT encoders) sources were not provided;
    # deterministic stand-in encoders with matching output shapes/roles are used instead.
    p["spat_embed"] = pg((seg * seg * C, E))
    p["spat_stage"] = [pg((E, E)) for _ in range(4)]
    p["spec_proj"] = pg((C, NT))            # AdaptiveAvgPool1d(1) folded into projection
    p["conv_features"] = [pg((E, NT)) for _ in range(4)]             # 1x1, bias=False
    p["fc_spec"] = [(pg((NT, 32)), pg((32, NT))) for _ in range(4)]  # bias=False
    p["conv1_w"], p["conv1_b"], p["conv1_bn"] = pg((NT, NT)), pg((NT,)), make_bn(pg, NT)
    p["conv2_w"], p["conv2_b"], p["conv2_bn"] = pg((NT, NT)), pg((NT,)), make_bn(pg, NT)
    p["conv3_w"], p["conv3_b"], p["conv3_bn"] = pg((3, 3, NT, NT)), pg((NT,)), make_bn(pg, NT)
    p["conv4_w"], p["conv4_b"], p["conv4_bn"] = pg((3, 3, NT, NT)), pg((NT,)), make_bn(pg, NT)
    p["smooth1_w"], p["smooth1_b"], p["smooth1_bn"] = (pg((3, 3, 4 * NT, 2 * NT)),
                                                       pg((2 * NT,)), make_bn(pg, 2 * NT))
    p["smooth2_w"], p["smooth2_b"] = pg((2 * NT, NT)), pg((NT,))
    p["conv5_w"], p["conv5_b"], p["conv5_bn"] = pg((NT, P)), pg((P,)), make_bn(pg, P)
    # TODO(synk): Decoder class source not provided; canonical linear-mixing decoder
    # (1x1 conv num_em -> channels, bias=False, non-negative endmembers) is used.
    p["decoder_w"] = jnp.abs(pg((P, C)))
    return p


def pack_params(p, cfg):
    """Build the fused / bf16 weight structures used by the Pallas kernel."""
    NT, E = cfg["NUM_TOKENS"], cfg["embed_dim"]
    H = W = cfg["patch_size"]
    seg = cfg["seg_patches"]
    Hp, Wp = H // seg, W // seg
    bf = lambda a: a.astype(jnp.bfloat16)
    f = {}
    # spatial encoder stand-in
    f["w_embed"] = bf(p["spat_embed"])
    f["w_stage"] = bf(jnp.stack(p["spat_stage"], axis=0))              # (4, E, E)
    # four conv_features 1x1 convs batched as one block-diagonal GEMM (N = 4*NT)
    wcf = jnp.zeros((4 * E, 4 * NT), jnp.float32)
    for i in range(4):
        wcf = wcf.at[i * E:(i + 1) * E, i * NT:(i + 1) * NT].set(p["conv_features"][i])
    f["w_cf"] = bf(wcf)
    # spectral path: pooled projection + four fc_spec MLPs batched (hidden = 4*32 = 128)
    f["w_spec"] = bf(p["spec_proj"])
    w1 = jnp.concatenate([p["fc_spec"][i][0] for i in range(4)], axis=1)   # (NT, 128)
    w2 = jnp.zeros((4 * 32, 4 * NT), jnp.float32)
    for i in range(4):
        w2 = w2.at[i * 32:(i + 1) * 32, i * NT:(i + 1) * NT].set(p["fc_spec"][i][1])
    f["w_fc1"], f["w_fc2"] = bf(w1), bf(w2)
    # conv1/conv2 (1x1) + conv3/conv4 (3x3) merged into a block-structured 3x3 conv
    # (HWIO layout, 1x1 blocks at the centre tap).  Output column blocks follow
    # torch.cat([p1, p2, p3, p4]) = [conv4(ss1), conv3(ss2), conv2(ss3), conv1(ss4)].
    wf = jnp.zeros((3, 3, 4 * NT, 4 * NT), jnp.float32)
    wf = wf.at[:, :, 0 * NT:1 * NT, 0 * NT:1 * NT].set(p["conv4_w"])
    wf = wf.at[:, :, 1 * NT:2 * NT, 1 * NT:2 * NT].set(p["conv3_w"])
    wf = wf.at[1, 1, 2 * NT:3 * NT, 2 * NT:3 * NT].set(p["conv2_w"])
    wf = wf.at[1, 1, 3 * NT:4 * NT, 3 * NT:4 * NT].set(p["conv1_w"])
    f["w_fpn"] = bf(wf.reshape(9 * 4 * NT, 4 * NT))
    b = jnp.concatenate([p["conv4_b"], p["conv3_b"], p["conv2_b"], p["conv1_b"]])
    s = jnp.concatenate([p["conv4_bn"][0], p["conv3_bn"][0],
                         p["conv2_bn"][0], p["conv1_bn"][0]])
    t = jnp.concatenate([p["conv4_bn"][1], p["conv3_bn"][1],
                         p["conv2_bn"][1], p["conv1_bn"][1]])
    f["ep_fpn"] = jnp.stack([b, s, t], axis=0)                         # (3, 4*NT) f32
    # smooth
    f["w_sm1"] = bf(p["smooth1_w"].reshape(9 * 4 * NT, 2 * NT))
    f["ep_sm1"] = jnp.stack([p["smooth1_b"], p["smooth1_bn"][0], p["smooth1_bn"][1]], axis=0)
    f["w_sm2"], f["b_sm2"] = bf(p["smooth2_w"]), p["smooth2_b"].reshape(1, -1)
    # conv5 + decoder
    f["w_c5"] = bf(p["conv5_w"])
    f["ep_c5"] = jnp.stack([p["conv5_b"], p["conv5_bn"][0], p["conv5_bn"][1]], axis=0)
    f["w_dec"] = p["decoder_w"]          # keep f32: abundances @ endmembers in f32
    # bilinear (align_corners=True) up-sample operator, hoisted to pack time (shape-static)
    f["R"] = bf(jnp.kron(_interp_matrix(H, Hp), _interp_matrix(W, Wp)))
    return f


# ---------------------------------------------------------------------------
# Model forward (inference: Dropout inactive, BatchNorm in eval mode).
# ---------------------------------------------------------------------------
def get_abundances_and_output(x_nhwc, fp, cfg):
    B, H, W, C = x_nhwc.shape
    seg, P = cfg["seg_patches"], cfg["num_em"]
    Hp, Wp = H // seg, W // seg
    # Spectral GAP (AdaptiveAvgPool1d folded); row-replicated to 8 sublanes for alignment.
    gap = jnp.mean(x_nhwc, axis=(1, 2))                                # (B, C)
    gap8 = jnp.broadcast_to(gap[:, None, :], (B, 8, C)).astype(jnp.bfloat16)
    # Patch extraction for the spatial encoder stand-in (pure layout, tiny, done in XLA).
    patches = (x_nhwc.reshape(B, Hp, seg, Wp, seg, C)
               .transpose(0, 1, 3, 2, 4, 5)
               .reshape(B, Hp * Wp, seg * seg * C)).astype(jnp.bfloat16)
    packed = fused_forward(gap8, patches, fp, cfg)                     # (B, H*W, OUT_PAD)
    abunds = packed[:, :, :P].reshape(B, H, W, P)
    out = packed[:, :, P:P + C].reshape(B, H, W, C)
    return abunds, out


def hypersigma_unmix_forward(x_nchw, fp, cfg):
    x = jnp.transpose(x_nchw, (0, 2, 3, 1)).astype(jnp.float32)        # NCHW -> NHWC
    abunds, out = get_abundances_and_output(x, fp, cfg)
    return (jnp.transpose(abunds, (0, 3, 1, 2)),                       # back to NCHW
            jnp.transpose(out, (0, 3, 1, 2)))


# ---------------------------------------------------------------------------
if __name__ == "__main__":
    cfg = dict(patch_size=8, channels=16, seg_patches=2, embed_dim=32,
               NUM_TOKENS=16, num_em=4, scale=3.0)
    raw_params = init_params(cfg)
    params = pack_params(raw_params, cfg)

    key = jax.random.PRNGKey(0)
    x = jax.random.uniform(key, (2, cfg["channels"], cfg["patch_size"], cfg["patch_size"]),
                           dtype=jnp.float32)

    fwd = jax.jit(lambda inp: hypersigma_unmix_forward(inp, params, cfg))
    abunds, output = jax.block_until_ready(fwd(x))

    assert abunds.shape == (2, cfg["num_em"], cfg["patch_size"], cfg["patch_size"])
    assert output.shape == (2, cfg["channels"], cfg["patch_size"], cfg["patch_size"])
    assert bool(jnp.allclose(jnp.sum(abunds, axis=1), 1.0, atol=1e-5))
    print("KERNEL_OK")
</pallas_src>

<mosaic_0001>
module attributes {stable_mosaic.version = 11 : i64} {
  func.func @_hypersigma_kernel(%arg0: i32, %arg1: memref<1x8x16xbf16, #tpu.memory_space<vmem>>, %arg2: memref<1x16x64xbf16, #tpu.memory_space<vmem>>, %arg3: memref<16x16xbf16, #tpu.memory_space<vmem>>, %arg4: memref<16x128xbf16, #tpu.memory_space<vmem>>, %arg5: memref<128x64xbf16, #tpu.memory_space<vmem>>, %arg6: memref<64x32xbf16, #tpu.memory_space<vmem>>, %arg7: memref<4x32x32xbf16, #tpu.memory_space<vmem>>, %arg8: memref<128x64xbf16, #tpu.memory_space<vmem>>, %arg9: memref<64x16xbf16, #tpu.memory_space<vmem>>, %arg10: memref<576x64xbf16, #tpu.memory_space<vmem>>, %arg11: memref<3x64xf32, #tpu.memory_space<vmem>>, %arg12: memref<576x32xbf16, #tpu.memory_space<vmem>>, %arg13: memref<3x32xf32, #tpu.memory_space<vmem>>, %arg14: memref<32x16xbf16, #tpu.memory_space<vmem>>, %arg15: memref<1x16xf32, #tpu.memory_space<vmem>>, %arg16: memref<16x4xbf16, #tpu.memory_space<vmem>>, %arg17: memref<3x4xf32, #tpu.memory_space<vmem>>, %arg18: memref<4x16xf32, #tpu.memory_space<vmem>>, %arg19: memref<1x64x128xf32, #tpu.memory_space<vmem>>) attributes {dimension_semantics = [#tpu.dimension_semantics<parallel>], iteration_bounds = array<i64: 2>, scalar_prefetch = 0 : i64, scratch_operands = 0 : i64, tpu.core_type = #tpu.core_type<tc>, window_params = [{transform_indices = @transform_0, window_bounds = array<i64: 1, 8, 16>}, {transform_indices = @transform_1, window_bounds = array<i64: 1, 16, 64>}, {pipeline_mode = #tpu.pipeline_mode<synchronous>, transform_indices = @transform_2, window_bounds = array<i64: 16, 16>}, {pipeline_mode = #tpu.pipeline_mode<synchronous>, transform_indices = @transform_3, window_bounds = array<i64: 16, 128>}, {pipeline_mode = #tpu.pipeline_mode<synchronous>, transform_indices = @transform_4, window_bounds = array<i64: 128, 64>}, {pipeline_mode = #tpu.pipeline_mode<synchronous>, transform_indices = @transform_5, window_bounds = array<i64: 64, 32>}, {pipeline_mode = #tpu.pipeline_mode<synchronous>, transform_indices = @transform_6, window_bounds = array<i64: 4, 32, 32>}, {pipeline_mode = #tpu.pipeline_mode<synchronous>, transform_indices = @transform_7, window_bounds = array<i64: 128, 64>}, {pipeline_mode = #tpu.pipeline_mode<synchronous>, transform_indices = @transform_8, window_bounds = array<i64: 64, 16>}, {pipeline_mode = #tpu.pipeline_mode<synchronous>, transform_indices = @transform_9, window_bounds = array<i64: 576, 64>}, {pipeline_mode = #tpu.pipeline_mode<synchronous>, transform_indices = @transform_10, window_bounds = array<i64: 3, 64>}, {pipeline_mode = #tpu.pipeline_mode<synchronous>, transform_indices = @transform_11, window_bounds = array<i64: 576, 32>}, {pipeline_mode = #tpu.pipeline_mode<synchronous>, transform_indices = @transform_12, window_bounds = array<i64: 3, 32>}, {pipeline_mode = #tpu.pipeline_mode<synchronous>, transform_indices = @transform_13, window_bounds = array<i64: 32, 16>}, {pipeline_mode = #tpu.pipeline_mode<synchronous>, transform_indices = @transform_14, window_bounds = array<i64: 1, 16>}, {pipeline_mode = #tpu.pipeline_mode<synchronous>, transform_indices = @transform_15, window_bounds = array<i64: 16, 4>}, {pipeline_mode = #tpu.pipeline_mode<synchronous>, transform_indices = @transform_16, window_bounds = array<i64: 3, 4>}, {pipeline_mode = #tpu.pipeline_mode<synchronous>, transform_indices = @transform_17, window_bounds = array<i64: 4, 16>}, {transform_indices = @transform_18, window_bounds = array<i64: 1, 64, 128>}]} {
    %c0 = arith.constant 0 : index
    %c0_0 = arith.constant 0 : index
    %c0_1 = arith.constant 0 : index
    %0 = vector.load %arg1[%c0, %c0_0, %c0_1] : memref<1x8x16xbf16, #tpu.memory_space<vmem>>, vector<1x8x16xbf16>
    %1 = vector.shape_cast %0 : vector<1x8x16xbf16> to vector<8x16xbf16>
    %c0_2 = arith.constant 0 : index
    %c0_3 = arith.constant 0 : index
    %2 = vector.load %arg3[%c0_2, %c0_3] : memref<16x16xbf16, #tpu.memory_space<vmem>>, vector<16x16xbf16>
    %cst = arith.constant dense<0.000000e+00> : vector<8x16xf32>
    %3 = tpu.matmul %1, %2, %cst {dimension_numbers = #tpu.dot_dimension_numbers<[1], [0], [0], [1], [0, 0, 1, 1], [], []>} : vector<8x16xbf16>, vector<16x16xbf16>, vector<8x16xf32> -> vector<8x16xf32>
    %cst_4 = arith.constant 0.000000e+00 : f32
    %4 = vector.broadcast %cst_4 : f32 to vector<8x16xf32>
    %5 = arith.maximumf %3, %4 : vector<8x16xf32>
    %6 = arith.truncf %5 : vector<8x16xf32> to vector<8x16xbf16>
    %c0_5 = arith.constant 0 : index
    %c0_6 = arith.constant 0 : index
    %7 = vector.load %arg4[%c0_5, %c0_6] : memref<16x128xbf16, #tpu.memory_space<vmem>>, vector<16x128xbf16>
    %cst_7 = arith.constant dense<0.000000e+00> : vector<8x128xf32>
    %8 = tpu.matmul %6, %7, %cst_7 {dimension_numbers = #tpu.dot_dimension_numbers<[1], [0], [0], [1], [0, 0, 1, 1], [], []>} : vector<8x16xbf16>, vector<16x128xbf16>, vector<8x128xf32> -> vector<8x128xf32>
    %cst_8 = arith.constant 0.000000e+00 : f32
    %9 = vector.broadcast %cst_8 : f32 to vector<8x128xf32>
    %10 = arith.maximumf %8, %9 : vector<8x128xf32>
    %11 = arith.truncf %10 : vector<8x128xf32> to vector<8x128xbf16>
    %c0_9 = arith.constant 0 : index
    %c0_10 = arith.constant 0 : index
    %12 = vector.load %arg5[%c0_9, %c0_10] : memref<128x64xbf16, #tpu.memory_space<vmem>>, vector<128x64xbf16>
    %cst_11 = arith.constant dense<0.000000e+00> : vector<8x64xf32>
    %13 = tpu.matmul %11, %12, %cst_11 {dimension_numbers = #tpu.dot_dimension_numbers<[1], [0], [0], [1], [0, 0, 1, 1], [], []>} : vector<8x128xbf16>, vector<128x64xbf16>, vector<8x64xf32> -> vector<8x64xf32>
    %14 = vector.extract_strided_slice %13 {offsets = [0, 0], sizes = [1, 64], strides = [1, 1]} : vector<8x64xf32> to vector<1x64xf32>
    %cst_12 = arith.constant 0.000000e+00 : f32
    %15 = vector.broadcast %cst_12 : f32 to vector<1x64xf32>
    %16 = arith.subf %15, %14 : vector<1x64xf32>
    %17 = math.exp %16 : vector<1x64xf32>
    %cst_13 = arith.constant 1.000000e+00 : f32
    %18 = vector.broadcast %cst_13 : f32 to vector<1x64xf32>
    %19 = arith.addf %18, %17 : vector<1x64xf32>
    %cst_14 = arith.constant 1.000000e+00 : f32
    %20 = vector.broadcast %cst_14 : f32 to vector<1x64xf32>
    %21 = arith.divf %20, %19 : vector<1x64xf32>
    %cst_15 = arith.constant 1.000000e+00 : f32
    %22 = vector.broadcast %cst_15 : f32 to vector<1x64xf32>
    %23 = arith.addf %22, %21 : vector<1x64xf32>
    %c0_16 = arith.constant 0 : index
    %c0_17 = arith.constant 0 : index
    %c0_18 = arith.constant 0 : index
    %24 = vector.load %arg2[%c0_16, %c0_17, %c0_18] : memref<1x16x64xbf16, #tpu.memory_space<vmem>>, vector<1x16x64xbf16>
    %25 = vector.shape_cast %24 : vector<1x16x64xbf16> to vector<16x64xbf16>
    %c0_19 = arith.constant 0 : index
    %c0_20 = arith.constant 0 : index
    %26 = vector.load %arg6[%c0_19, %c0_20] : memref<64x32xbf16, #tpu.memory_space<vmem>>, vector<64x32xbf16>
    %cst_21 = arith.constant dense<0.000000e+00> : vector<16x32xf32>
    %27 = tpu.matmul %25, %26, %cst_21 {dimension_numbers = #tpu.dot_dimension_numbers<[1], [0], [0], [1], [0, 0, 1, 1], [], []>} : vector<16x64xbf16>, vector<64x32xbf16>, vector<16x32xf32> -> vector<16x32xf32>
    %28 = arith.truncf %27 : vector<16x32xf32> to vector<16x32xbf16>
    %c0_22 = arith.constant 0 : index
    %c0_23 = arith.constant 0 : index
    %c0_24 = arith.constant 0 : index
    %29 = vector.load %arg7[%c0_22, %c0_23, %c0_24] : memref<4x32x32xbf16, #tpu.memory_space<vmem>>, vector<1x32x32xbf16>
    %30 = vector.shape_cast %29 : vector<1x32x32xbf16> to vector<32x32xbf16>
    %cst_25 = arith.constant dense<0.000000e+00> : vector<16x32xf32>
    %31 = tpu.matmul %28, %30, %cst_25 {dimension_numbers = #tpu.dot_dimension_numbers<[1], [0], [0], [1], [0, 0, 1, 1], [], []>} : vector<16x32xbf16>, vector<32x32xbf16>, vector<16x32xf32> -> vector<16x32xf32>
    %cst_26 = arith.constant 0.000000e+00 : f32
    %32 = vector.broadcast %cst_26 : f32 to vector<16x32xf32>
    %33 = arith.maximumf %31, %32 : vector<16x32xf32>
    %34 = arith.truncf %33 : vector<16x32xf32> to vector<16x32xbf16>
    %c1 = arith.constant 1 : index
    %c0_27 = arith.constant 0 : index
    %c0_28 = arith.constant 0 : index
    %35 = vector.load %arg7[%c1, %c0_27, %c0_28] : memref<4x32x32xbf16, #tpu.memory_space<vmem>>, vector<1x32x32xbf16>
    %36 = vector.shape_cast %35 : vector<1x32x32xbf16> to vector<32x32xbf16>
    %cst_29 = arith.constant dense<0.000000e+00> : vector<16x32xf32>
    %37 = tpu.matmul %34, %36, %cst_29 {dimension_numbers = #tpu.dot_dimension_numbers<[1], [0], [0], [1], [0, 0, 1, 1], [], []>} : vector<16x32xbf16>, vector<32x32xbf16>, vector<16x32xf32> -> vector<16x32xf32>
    %cst_30 = arith.constant 0.000000e+00 : f32
    %38 = vector.broadcast %cst_30 : f32 to vector<16x32xf32>
    %39 = arith.maximumf %37, %38 : vector<16x32xf32>
    %40 = arith.truncf %39 : vector<16x32xf32> to vector<16x32xbf16>
    %c2 = arith.constant 2 : index
    %c0_31 = arith.constant 0 : index
    %c0_32 = arith.constant 0 : index
    %41 = vector.load %arg7[%c2, %c0_31, %c0_32] : memref<4x32x32xbf16, #tpu.memory_space<vmem>>, vector<1x32x32xbf16>
    %42 = vector.shape_cast %41 : vector<1x32x32xbf16> to vector<32x32xbf16>
    %cst_33 = arith.constant dense<0.000000e+00> : vector<16x32xf32>
    %43 = tpu.matmul %40, %42, %cst_33 {dimension_numbers = #tpu.dot_dimension_numbers<[1], [0], [0], [1], [0, 0, 1, 1], [], []>} : vector<16x32xbf16>, vector<32x32xbf16>, vector<16x32xf32> -> vector<16x32xf32>
    %cst_34 = arith.constant 0.000000e+00 : f32
    %44 = vector.broadcast %cst_34 : f32 to vector<16x32xf32>
    %45 = arith.maximumf %43, %44 : vector<16x32xf32>
    %46 = arith.truncf %45 : vector<16x32xf32> to vector<16x32xbf16>
    %c3 = arith.constant 3 : index
    %c0_35 = arith.constant 0 : index
    %c0_36 = arith.constant 0 : index
    %47 = vector.load %arg7[%c3, %c0_35, %c0_36] : memref<4x32x32xbf16, #tpu.memory_space<vmem>>, vector<1x32x32xbf16>
    %48 = vector.shape_cast %47 : vector<1x32x32xbf16> to vector<32x32xbf16>
    %cst_37 = arith.constant dense<0.000000e+00> : vector<16x32xf32>
    %49 = tpu.matmul %46, %48, %cst_37 {dimension_numbers = #tpu.dot_dimension_numbers<[1], [0], [0], [1], [0, 0, 1, 1], [], []>} : vector<16x32xbf16>, vector<32x32xbf16>, vector<16x32xf32> -> vector<16x32xf32>
    %cst_38 = arith.constant 0.000000e+00 : f32
    %50 = vector.broadcast %cst_38 : f32 to vector<16x32xf32>
    %51 = arith.maximumf %49, %50 : vector<16x32xf32>
    %52 = tpu.concatenate %33, %39, %45, %51 in 1 : vector<16x32xf32>, vector<16x32xf32>, vector<16x32xf32>, vector<16x32xf32> -> vector<16x128xf32>
    %53 = arith.truncf %52 : vector<16x128xf32> to vector<16x128xbf16>
    %c0_39 = arith.constant 0 : index
    %c0_40 = arith.constant 0 : index
    %54 = vector.load %arg8[%c0_39, %c0_40] : memref<128x64xbf16, #tpu.memory_space<vmem>>, vector<128x64xbf16>
    %cst_41 = arith.constant dense<0.000000e+00> : vector<16x64xf32>
    %55 = tpu.matmul %53, %54, %cst_41 {dimension_numbers = #tpu.dot_dimension_numbers<[1], [0], [0], [1], [0, 0, 1, 1], [], []>} : vector<16x128xbf16>, vector<128x64xbf16>, vector<16x64xf32> -> vector<16x64xf32>
    %56 = vector.broadcast %23 : vector<1x64xf32> to vector<16x64xf32>
    %57 = arith.mulf %56, %55 : vector<16x64xf32>
    %58 = arith.truncf %57 : vector<16x64xf32> to vector<16x64xbf16>
    %cst_42 = arith.constant 0.000000e+00 : bf16
    %59 = vector.broadcast %cst_42 : bf16 to vector<1x64xbf16>
    %60 = tpu.iota {dimensions = array<i32: 0>} : vector<16x1xi32>
    %c4_i32 = arith.constant 4 : i32
    %c0_i32 = arith.constant 0 : i32
    %61 = arith.cmpi eq, %c4_i32, %c0_i32 : i32
    %c1_i32 = arith.constant 1 : i32
    %62 = arith.select %61, %c1_i32, %c4_i32 : i32
    %63 = vector.broadcast %62 : i32 to vector<16x1xi32>
    %64 = arith.remsi %60, %63 : vector<16x1xi32>
    %c0_i32_43 = arith.constant 0 : i32
    %65 = vector.broadcast %c0_i32_43 : i32 to vector<16x1xi32>
    %66 = arith.cmpi ne, %64, %65 : vector<16x1xi32>
    %c0_i32_44 = arith.constant 0 : i32
    %67 = vector.broadcast %c0_i32_44 : i32 to vector<16x1xi32>
    %68 = arith.cmpi slt, %64, %67 : vector<16x1xi32>
    %c0_i32_45 = arith.constant 0 : i32
    %69 = arith.cmpi slt, %62, %c0_i32_45 : i32
    %70 = vector.broadcast %69 : i1 to vector<16x1xi1>
    %71 = vector.broadcast %70 : vector<16x1xi1> to vector<16x1xi1>
    %72 = arith.xori %68, %71 : vector<16x1xi1>
    %73 = arith.andi %72, %66 : vector<16x1xi1>
    %74 = vector.broadcast %62 : i32 to vector<16x1xi32>
    %75 = arith.addi %64, %74 : vector<16x1xi32>
    %76 = arith.select %73, %75, %64 : vector<16x1xi1>, vector<16x1xi32>
    %c0_i32_46 = arith.constant 0 : i32
    %77 = vector.broadcast %c0_i32_46 : i32 to vector<16x1xi32>
    %78 = arith.cmpi ne, %76, %77 : vector<16x1xi32>
    %79 = arith.extui %78 : vector<16x1xi1> to vector<16x1xi32>
    %80 = arith.sitofp %79 : vector<16x1xi32> to vector<16x1xf32>
    %81 = arith.truncf %80 : vector<16x1xf32> to vector<16x1xbf16>
    %c3_i32 = arith.constant 3 : i32
    %82 = vector.broadcast %c3_i32 : i32 to vector<16x1xi32>
    %83 = arith.cmpi ne, %76, %82 : vector<16x1xi32>
    %84 = arith.extui %83 : vector<16x1xi1> to vector<16x1xi32>
    %85 = arith.sitofp %84 : vector<16x1xi32> to vector<16x1xf32>
    %86 = arith.truncf %85 : vector<16x1xf32> to vector<16x1xbf16>
    %87 = vector.extract_strided_slice %58 {offsets = [0, 0], sizes = [15, 64], strides = [1, 1]} : vector<16x64xbf16> to vector<15x64xbf16>
    %88 = tpu.concatenate %59, %87 in 0 : vector<1x64xbf16>, vector<15x64xbf16> -> vector<16x64xbf16>
    %89 = vector.broadcast %81 : vector<16x1xbf16> to vector<16x64xbf16>
    %90 = arith.mulf %88, %89 : vector<16x64xbf16>
    %91 = vector.extract_strided_slice %58 {offsets = [1, 0], sizes = [15, 64], strides = [1, 1]} : vector<16x64xbf16> to vector<15x64xbf16>
    %92 = tpu.concatenate %91, %59 in 0 : vector<15x64xbf16>, vector<1x64xbf16> -> vector<16x64xbf16>
    %93 = vector.broadcast %86 : vector<16x1xbf16> to vector<16x64xbf16>
    %94 = arith.mulf %92, %93 : vector<16x64xbf16>
    %95 = tpu.concatenate %90, %58, %94 in 1 : vector<16x64xbf16>, vector<16x64xbf16>, vector<16x64xbf16> -> vector<16x192xbf16>
    %cst_47 = arith.constant 0.000000e+00 : bf16
    %96 = vector.broadcast %cst_47 : bf16 to vector<4x192xbf16>
    %97 = vector.extract_strided_slice %95 {offsets = [0, 0], sizes = [12, 192], strides = [1, 1]} : vector<16x192xbf16> to vector<12x192xbf16>
    %98 = tpu.concatenate %96, %97 in 0 : vector<4x192xbf16>, vector<12x192xbf16> -> vector<16x192xbf16>
    %c0_48 = arith.constant 0 : index
    %c0_49 = arith.constant 0 : index
    %99 = vector.load %arg10[%c0_48, %c0_49] : memref<576x64xbf16, #tpu.memory_space<vmem>>, vector<192x64xbf16>
    %cst_50 = arith.constant dense<0.000000e+00> : vector<16x64xf32>
    %100 = tpu.matmul %98, %99, %cst_50 {dimension_numbers = #tpu.dot_dimension_numbers<[1], [0], [0], [1], [0, 0, 1, 1], [], []>} : vector<16x192xbf16>, vector<192x64xbf16>, vector<16x64xf32> -> vector<16x64xf32>
    %c192 = arith.constant 192 : index
    %c0_51 = arith.constant 0 : index
    %101 = vector.load %arg10[%c192, %c0_51] : memref<576x64xbf16, #tpu.memory_space<vmem>>, vector<192x64xbf16>
    %cst_52 = arith.constant dense<0.000000e+00> : vector<16x64xf32>
    %102 = tpu.matmul %95, %101, %cst_52 {dimension_numbers = #tpu.dot_dimension_numbers<[1], [0], [0], [1], [0, 0, 1, 1], [], []>} : vector<16x192xbf16>, vector<192x64xbf16>, vector<16x64xf32> -> vector<16x64xf32>
    %103 = arith.addf %100, %102 : vector<16x64xf32>
    %104 = vector.extract_strided_slice %95 {offsets = [4, 0], sizes = [12, 192], strides = [1, 1]} : vector<16x192xbf16> to vector<12x192xbf16>
    %105 = tpu.concatenate %104, %96 in 0 : vector<12x192xbf16>, vector<4x192xbf16> -> vector<16x192xbf16>
    %c384 = arith.constant 384 : index
    %c0_53 = arith.constant 0 : index
    %106 = vector.load %arg10[%c384, %c0_53] : memref<576x64xbf16, #tpu.memory_space<vmem>>, vector<192x64xbf16>
    %cst_54 = arith.constant dense<0.000000e+00> : vector<16x64xf32>
    %107 = tpu.matmul %105, %106, %cst_54 {dimension_numbers = #tpu.dot_dimension_numbers<[1], [0], [0], [1], [0, 0, 1, 1], [], []>} : vector<16x192xbf16>, vector<192x64xbf16>, vector<16x64xf32> -> vector<16x64xf32>
    %108 = arith.addf %103, %107 : vector<16x64xf32>
    %c0_55 = arith.constant 0 : index
    %c0_56 = arith.constant 0 : index
    %109 = vector.load %arg11[%c0_55, %c0_56] : memref<3x64xf32, #tpu.memory_space<vmem>>, vector<3x64xf32>
    %110 = vector.extract_strided_slice %109 {offsets = [0, 0], sizes = [1, 64], strides = [1, 1]} : vector<3x64xf32> to vector<1x64xf32>
    %111 = vector.broadcast %110 : vector<1x64xf32> to vector<16x64xf32>
    %112 = arith.addf %108, %111 : vector<16x64xf32>
    %cst_57 = arith.constant 0.000000e+00 : f32
    %113 = vector.broadcast %cst_57 : f32 to vector<16x64xf32>
    %114 = arith.cmpf oge, %112, %113 : vector<16x64xf32>
    %cst_58 = arith.constant 2.000000e-02 : f32
    %115 = vector.broadcast %cst_58 : f32 to vector<16x64xf32>
    %116 = arith.mulf %115, %112 : vector<16x64xf32>
    %117 = arith.select %114, %112, %116 : vector<16x64xi1>, vector<16x64xf32>
    %118 = vector.extract_strided_slice %109 {offsets = [1, 0], sizes = [1, 64], strides = [1, 1]} : vector<3x64xf32> to vector<1x64xf32>
    %119 = vector.broadcast %118 : vector<1x64xf32> to vector<16x64xf32>
    %120 = arith.mulf %117, %119 : vector<16x64xf32>
    %121 = vector.extract_strided_slice %109 {offsets = [2, 0], sizes = [1, 64], strides = [1, 1]} : vector<3x64xf32> to vector<1x64xf32>
    %122 = vector.broadcast %121 : vector<1x64xf32> to vector<16x64xf32>
    %123 = arith.addf %120, %122 : vector<16x64xf32>
    %c0_59 = arith.constant 0 : index
    %c0_60 = arith.constant 0 : index
    %124 = vector.load %arg9[%c0_59, %c0_60] : memref<64x16xbf16, #tpu.memory_space<vmem>>, vector<64x16xbf16>
    %125 = arith.truncf %123 : vector<16x64xf32> to vector<16x64xbf16>
    %cst_61 = arith.constant dense<0.000000e+00> : vector<64x64xf32>
    %126 = tpu.matmul %124, %125, %cst_61 {dimension_numbers = #tpu.dot_dimension_numbers<[1], [0], [0], [1], [0, 0, 1, 1], [], []>} : vector<64x16xbf16>, vector<16x64xbf16>, vector<64x64xf32> -> vector<64x64xf32>
    %127 = arith.truncf %126 : vector<64x64xf32> to vector<64x64xbf16>
    %cst_62 = arith.constant 0.000000e+00 : bf16
    %128 = vector.broadcast %cst_62 : bf16 to vector<1x64xbf16>
    %129 = tpu.iota {dimensions = array<i32: 0>} : vector<64x1xi32>
    %c8_i32 = arith.constant 8 : i32
    %c0_i32_63 = arith.constant 0 : i32
    %130 = arith.cmpi eq, %c8_i32, %c0_i32_63 : i32
    %c1_i32_64 = arith.constant 1 : i32
    %131 = arith.select %130, %c1_i32_64, %c8_i32 : i32
    %132 = vector.broadcast %131 : i32 to vector<64x1xi32>
    %133 = arith.remsi %129, %132 : vector<64x1xi32>
    %c0_i32_65 = arith.constant 0 : i32
    %134 = vector.broadcast %c0_i32_65 : i32 to vector<64x1xi32>
    %135 = arith.cmpi ne, %133, %134 : vector<64x1xi32>
    %c0_i32_66 = arith.constant 0 : i32
    %136 = vector.broadcast %c0_i32_66 : i32 to vector<64x1xi32>
    %137 = arith.cmpi slt, %133, %136 : vector<64x1xi32>
    %c0_i32_67 = arith.constant 0 : i32
    %138 = arith.cmpi slt, %131, %c0_i32_67 : i32
    %139 = vector.broadcast %138 : i1 to vector<64x1xi1>
    %140 = vector.broadcast %139 : vector<64x1xi1> to vector<64x1xi1>
    %141 = arith.xori %137, %140 : vector<64x1xi1>
    %142 = arith.andi %141, %135 : vector<64x1xi1>
    %143 = vector.broadcast %131 : i32 to vector<64x1xi32>
    %144 = arith.addi %133, %143 : vector<64x1xi32>
    %145 = arith.select %142, %144, %133 : vector<64x1xi1>, vector<64x1xi32>
    %c0_i32_68 = arith.constant 0 : i32
    %146 = vector.broadcast %c0_i32_68 : i32 to vector<64x1xi32>
    %147 = arith.cmpi ne, %145, %146 : vector<64x1xi32>
    %148 = arith.extui %147 : vector<64x1xi1> to vector<64x1xi32>
    %149 = arith.sitofp %148 : vector<64x1xi32> to vector<64x1xf32>
    %150 = arith.truncf %149 : vector<64x1xf32> to vector<64x1xbf16>
    %c7_i32 = arith.constant 7 : i32
    %151 = vector.broadcast %c7_i32 : i32 to vector<64x1xi32>
    %152 = arith.cmpi ne, %145, %151 : vector<64x1xi32>
    %153 = arith.extui %152 : vector<64x1xi1> to vector<64x1xi32>
    %154 = arith.sitofp %153 : vector<64x1xi32> to vector<64x1xf32>
    %155 = arith.truncf %154 : vector<64x1xf32> to vector<64x1xbf16>
    %156 = vector.extract_strided_slice %127 {offsets = [0, 0], sizes = [63, 64], strides = [1, 1]} : vector<64x64xbf16> to vector<63x64xbf16>
    %157 = tpu.concatenate %128, %156 in 0 : vector<1x64xbf16>, vector<63x64xbf16> -> vector<64x64xbf16>
    %158 = vector.broadcast %150 : vector<64x1xbf16> to vector<64x64xbf16>
    %159 = arith.mulf %157, %158 : vector<64x64xbf16>
    %160 = vector.extract_strided_slice %127 {offsets = [1, 0], sizes = [63, 64], strides = [1, 1]} : vector<64x64xbf16> to vector<63x64xbf16>
    %161 = tpu.concatenate %160, %128 in 0 : vector<63x64xbf16>, vector<1x64xbf16> -> vector<64x64xbf16>
    %162 = vector.broadcast %155 : vector<64x1xbf16> to vector<64x64xbf16>
    %163 = arith.mulf %161, %162 : vector<64x64xbf16>
    %164 = tpu.concatenate %159, %127, %163 in 1 : vector<64x64xbf16>, vector<64x64xbf16>, vector<64x64xbf16> -> vector<64x192xbf16>
    %cst_69 = arith.constant 0.000000e+00 : bf16
    %165 = vector.broadcast %cst_69 : bf16 to vector<8x192xbf16>
    %166 = vector.extract_strided_slice %164 {offsets = [0, 0], sizes = [56, 192], strides = [1, 1]} : vector<64x192xbf16> to vector<56x192xbf16>
    %167 = tpu.concatenate %165, %166 in 0 : vector<8x192xbf16>, vector<56x192xbf16> -> vector<64x192xbf16>
    %c0_70 = arith.constant 0 : index
    %c0_71 = arith.constant 0 : index
    %168 = vector.load %arg12[%c0_70, %c0_71] : memref<576x32xbf16, #tpu.memory_space<vmem>>, vector<192x32xbf16>
    %cst_72 = arith.constant dense<0.000000e+00> : vector<64x32xf32>
    %169 = tpu.matmul %167, %168, %cst_72 {dimension_numbers = #tpu.dot_dimension_numbers<[1], [0], [0], [1], [0, 0, 1, 1], [], []>} : vector<64x192xbf16>, vector<192x32xbf16>, vector<64x32xf32> -> vector<64x32xf32>
    %c192_73 = arith.constant 192 : index
    %c0_74 = arith.constant 0 : index
    %170 = vector.load %arg12[%c192_73, %c0_74] : memref<576x32xbf16, #tpu.memory_space<vmem>>, vector<192x32xbf16>
    %cst_75 = arith.constant dense<0.000000e+00> : vector<64x32xf32>
    %171 = tpu.matmul %164, %170, %cst_75 {dimension_numbers = #tpu.dot_dimension_numbers<[1], [0], [0], [1], [0, 0, 1, 1], [], []>} : vector<64x192xbf16>, vector<192x32xbf16>, vector<64x32xf32> -> vector<64x32xf32>
    %172 = arith.addf %169, %171 : vector<64x32xf32>
    %173 = vector.extract_strided_slice %164 {offsets = [8, 0], sizes = [56, 192], strides = [1, 1]} : vector<64x192xbf16> to vector<56x192xbf16>
    %174 = tpu.concatenate %173, %165 in 0 : vector<56x192xbf16>, vector<8x192xbf16> -> vector<64x192xbf16>
    %c384_76 = arith.constant 384 : index
    %c0_77 = arith.constant 0 : index
    %175 = vector.load %arg12[%c384_76, %c0_77] : memref<576x32xbf16, #tpu.memory_space<vmem>>, vector<192x32xbf16>
    %cst_78 = arith.constant dense<0.000000e+00> : vector<64x32xf32>
    %176 = tpu.matmul %174, %175, %cst_78 {dimension_numbers = #tpu.dot_dimension_numbers<[1], [0], [0], [1], [0, 0, 1, 1], [], []>} : vector<64x192xbf16>, vector<192x32xbf16>, vector<64x32xf32> -> vector<64x32xf32>
    %177 = arith.addf %172, %176 : vector<64x32xf32>
    %c0_79 = arith.constant 0 : index
    %c0_80 = arith.constant 0 : index
    %178 = vector.load %arg13[%c0_79, %c0_80] : memref<3x32xf32, #tpu.memory_space<vmem>>, vector<3x32xf32>
    %179 = vector.extract_strided_slice %178 {offsets = [0, 0], sizes = [1, 32], strides = [1, 1]} : vector<3x32xf32> to vector<1x32xf32>
    %180 = vector.broadcast %179 : vector<1x32xf32> to vector<64x32xf32>
    %181 = arith.addf %177, %180 : vector<64x32xf32>
    %cst_81 = arith.constant 0.000000e+00 : f32
    %182 = vector.broadcast %cst_81 : f32 to vector<64x32xf32>
    %183 = arith.cmpf oge, %181, %182 : vector<64x32xf32>
    %cst_82 = arith.constant 2.000000e-02 : f32
    %184 = vector.broadcast %cst_82 : f32 to vector<64x32xf32>
    %185 = arith.mulf %184, %181 : vector<64x32xf32>
    %186 = arith.select %183, %181, %185 : vector<64x32xi1>, vector<64x32xf32>
    %187 = vector.extract_strided_slice %178 {offsets = [1, 0], sizes = [1, 32], strides = [1, 1]} : vector<3x32xf32> to vector<1x32xf32>
    %188 = vector.broadcast %187 : vector<1x32xf32> to vector<64x32xf32>
    %189 = arith.mulf %186, %188 : vector<64x32xf32>
    %190 = vector.extract_strided_slice %178 {offsets = [2, 0], sizes = [1, 32], strides = [1, 1]} : vector<3x32xf32> to vector<1x32xf32>
    %191 = vector.broadcast %190 : vector<1x32xf32> to vector<64x32xf32>
    %192 = arith.addf %189, %191 : vector<64x32xf32>
    %193 = arith.truncf %192 : vector<64x32xf32> to vector<64x32xbf16>
    %c0_83 = arith.constant 0 : index
    %c0_84 = arith.constant 0 : index
    %194 = vector.load %arg14[%c0_83, %c0_84] : memref<32x16xbf16, #tpu.memory_space<vmem>>, vector<32x16xbf16>
    %cst_85 = arith.constant dense<0.000000e+00> : vector<64x16xf32>
    %195 = tpu.matmul %193, %194, %cst_85 {dimension_numbers = #tpu.dot_dimension_numbers<[1], [0], [0], [1], [0, 0, 1, 1], [], []>} : vector<64x32xbf16>, vector<32x16xbf16>, vector<64x16xf32> -> vector<64x16xf32>
    %c0_86 = arith.constant 0 : index
    %c0_87 = arith.constant 0 : index
    %196 = vector.load %arg15[%c0_86, %c0_87] : memref<1x16xf32, #tpu.memory_space<vmem>>, vector<1x16xf32>
    %197 = vector.broadcast %196 : vector<1x16xf32> to vector<64x16xf32>
    %198 = arith.addf %195, %197 : vector<64x16xf32>
    %199 = arith.truncf %198 : vector<64x16xf32> to vector<64x16xbf16>
    %c0_88 = arith.constant 0 : index
    %c0_89 = arith.constant 0 : index
    %200 = vector.load %arg16[%c0_88, %c0_89] : memref<16x4xbf16, #tpu.memory_space<vmem>>, vector<16x4xbf16>
    %cst_90 = arith.constant dense<0.000000e+00> : vector<64x4xf32>
    %201 = tpu.matmul %199, %200, %cst_90 {dimension_numbers = #tpu.dot_dimension_numbers<[1], [0], [0], [1], [0, 0, 1, 1], [], []>} : vector<64x16xbf16>, vector<16x4xbf16>, vector<64x4xf32> -> vector<64x4xf32>
    %c0_91 = arith.constant 0 : index
    %c0_92 = arith.constant 0 : index
    %202 = vector.load %arg17[%c0_91, %c0_92] : memref<3x4xf32, #tpu.memory_space<vmem>>, vector<3x4xf32>
    %203 = vector.extract_strided_slice %202 {offsets = [0, 0], sizes = [1, 4], strides = [1, 1]} : vector<3x4xf32> to vector<1x4xf32>
    %204 = vector.broadcast %203 : vector<1x4xf32> to vector<64x4xf32>
    %205 = arith.addf %201, %204 : vector<64x4xf32>
    %cst_93 = arith.constant 0.000000e+00 : f32
    %206 = vector.broadcast %cst_93 : f32 to vector<64x4xf32>
    %207 = arith.cmpf oge, %205, %206 : vector<64x4xf32>
    %cst_94 = arith.constant 2.000000e-02 : f32
    %208 = vector.broadcast %cst_94 : f32 to vector<64x4xf32>
    %209 = arith.mulf %208, %205 : vector<64x4xf32>
    %210 = arith.select %207, %205, %209 : vector<64x4xi1>, vector<64x4xf32>
    %211 = vector.extract_strided_slice %202 {offsets = [1, 0], sizes = [1, 4], strides = [1, 1]} : vector<3x4xf32> to vector<1x4xf32>
    %212 = vector.broadcast %211 : vector<1x4xf32> to vector<64x4xf32>
    %213 = arith.mulf %210, %212 : vector<64x4xf32>
    %214 = vector.extract_strided_slice %202 {offsets = [2, 0], sizes = [1, 4], strides = [1, 1]} : vector<3x4xf32> to vector<1x4xf32>
    %215 = vector.broadcast %214 : vector<1x4xf32> to vector<64x4xf32>
    %216 = arith.addf %213, %215 : vector<64x4xf32>
    %cst_95 = arith.constant 3.000000e+00 : f32
    %217 = vector.broadcast %cst_95 : f32 to vector<64x4xf32>
    %218 = arith.mulf %217, %216 : vector<64x4xf32>
    %cst_96 = arith.constant dense<0xFF800000> : vector<64xf32>
    %219 = vector.multi_reduction <maximumf>, %218, %cst_96 [1] : vector<64x4xf32> to vector<64xf32>
    %220 = vector.shape_cast %219 : vector<64xf32> to vector<64x1xf32>
    %221 = vector.broadcast %220 : vector<64x1xf32> to vector<64x4xf32>
    %222 = arith.subf %218, %221 : vector<64x4xf32>
    %223 = math.exp %222 : vector<64x4xf32>
    %cst_97 = arith.constant dense<0.000000e+00> : vector<64xf32>
    %224 = vector.multi_reduction <add>, %223, %cst_97 [1] : vector<64x4xf32> to vector<64xf32>
    %225 = vector.shape_cast %224 : vector<64xf32> to vector<64x1xf32>
    %226 = vector.broadcast %225 : vector<64x1xf32> to vector<64x4xf32>
    %227 = arith.divf %223, %226 : vector<64x4xf32>
    %c0_98 = arith.constant 0 : index
    %c0_99 = arith.constant 0 : index
    %228 = vector.load %arg18[%c0_98, %c0_99] : memref<4x16xf32, #tpu.memory_space<vmem>>, vector<4x16xf32>
    %cst_100 = arith.constant dense<0.000000e+00> : vector<64x16xf32>
    %229 = tpu.matmul %227, %228, %cst_100 {dimension_numbers = #tpu.dot_dimension_numbers<[1], [0], [0], [1], [0, 0, 1, 1], [], []>} : vector<64x4xf32>, vector<4x16xf32>, vector<64x16xf32> -> vector<64x16xf32>
    %cst_101 = arith.constant 0.000000e+00 : f32
    %230 = vector.broadcast %cst_101 : f32 to vector<64x108xf32>
    %231 = tpu.concatenate %227, %229, %230 in 1 : vector<64x4xf32>, vector<64x16xf32>, vector<64x108xf32> -> vector<64x128xf32>
    %c0_102 = arith.constant 0 : index
    %c0_103 = arith.constant 0 : index
    %c0_104 = arith.constant 0 : index
    %232 = vector.load %arg19[%c0_102, %c0_103, %c0_104] : memref<1x64x128xf32, #tpu.memory_space<vmem>>, vector<1x64x128xf32>
    %233 = vector.shape_cast %232 : vector<1x64x128xf32> to vector<64x128xf32>
    %234 = vector.shape_cast %231 : vector<64x128xf32> to vector<1x64x128xf32>
    tpu.vector_store %arg19[%c0_102, %c0_103, %c0_104], %234 {strides = array<i32>} : memref<1x64x128xf32, #tpu.memory_space<vmem>>, vector<1x64x128xf32>,
    return
  }
  func.func @transform_0(%arg0: i32) -> (i32, i32, i32) {
    %c0_i32 = arith.constant 0 : i32
    %c0_i32_0 = arith.constant 0 : i32
    %c0_i32_1 = arith.constant 0 : i32
    return %arg0, %c0_i32, %c0_i32_0 : i32, i32, i32
  }
  func.func @transform_1(%arg0: i32) -> (i32, i32, i32) {
    %c0_i32 = arith.constant 0 : i32
    %c0_i32_0 = arith.constant 0 : i32
    %c0_i32_1 = arith.constant 0 : i32
    return %arg0, %c0_i32, %c0_i32_0 : i32, i32, i32
  }
  func.func @transform_2(%arg0: i32) -> (i32, i32) {
    %c0_i32 = arith.constant 0 : i32
    %c0_i32_0 = arith.constant 0 : i32
    %c0_i32_1 = arith.constant 0 : i32
    return %c0_i32, %c0_i32_0 : i32, i32
  }
  func.func @transform_3(%arg0: i32) -> (i32, i32) {
    %c0_i32 = arith.constant 0 : i32
    %c0_i32_0 = arith.constant 0 : i32
    %c0_i32_1 = arith.constant 0 : i32
    return %c0_i32, %c0_i32_0 : i32, i32
  }
  func.func @transform_4(%arg0: i32) -> (i32, i32) {
    %c0_i32 = arith.constant 0 : i32
    %c0_i32_0 = arith.constant 0 : i32
    %c0_i32_1 = arith.constant 0 : i32
    return %c0_i32, %c0_i32_0 : i32, i32
  }
  func.func @transform_5(%arg0: i32) -> (i32, i32) {
    %c0_i32 = arith.constant 0 : i32
    %c0_i32_0 = arith.constant 0 : i32
    %c0_i32_1 = arith.constant 0 : i32
    return %c0_i32, %c0_i32_0 : i32, i32
  }
  func.func @transform_6(%arg0: i32) -> (i32, i32, i32) {
    %c0_i32 = arith.constant 0 : i32
    %c0_i32_0 = arith.constant 0 : i32
    %c0_i32_1 = arith.constant 0 : i32
    %c0_i32_2 = arith.constant 0 : i32
    return %c0_i32, %c0_i32_0, %c0_i32_1 : i32, i32, i32
  }
  func.func @transform_7(%arg0: i32) -> (i32, i32) {
    %c0_i32 = arith.constant 0 : i32
    %c0_i32_0 = arith.constant 0 : i32
    %c0_i32_1 = arith.constant 0 : i32
    return %c0_i32, %c0_i32_0 : i32, i32
  }
  func.func @transform_8(%arg0: i32) -> (i32, i32) {
    %c0_i32 = arith.constant 0 : i32
    %c0_i32_0 = arith.constant 0 : i32
    %c0_i32_1 = arith.constant 0 : i32
    return %c0_i32, %c0_i32_0 : i32, i32
  }
  func.func @transform_9(%arg0: i32) -> (i32, i32) {
    %c0_i32 = arith.constant 0 : i32
    %c0_i32_0 = arith.constant 0 : i32
    %c0_i32_1 = arith.constant 0 : i32
    return %c0_i32, %c0_i32_0 : i32, i32
  }
  func.func @transform_10(%arg0: i32) -> (i32, i32) {
    %c0_i32 = arith.constant 0 : i32
    %c0_i32_0 = arith.constant 0 : i32
    %c0_i32_1 = arith.constant 0 : i32
    return %c0_i32, %c0_i32_0 : i32, i32
  }
  func.func @transform_11(%arg0: i32) -> (i32, i32) {
    %c0_i32 = arith.constant 0 : i32
    %c0_i32_0 = arith.constant 0 : i32
    %c0_i32_1 = arith.constant 0 : i32
    return %c0_i32, %c0_i32_0 : i32, i32
  }
  func.func @transform_12(%arg0: i32) -> (i32, i32) {
    %c0_i32 = arith.constant 0 : i32
    %c0_i32_0 = arith.constant 0 : i32
    %c0_i32_1 = arith.constant 0 : i32
    return %c0_i32, %c0_i32_0 : i32, i32
  }
  func.func @transform_13(%arg0: i32) -> (i32, i32) {
    %c0_i32 = arith.constant 0 : i32
    %c0_i32_0 = arith.constant 0 : i32
    %c0_i32_1 = arith.constant 0 : i32
    return %c0_i32, %c0_i32_0 : i32, i32
  }
  func.func @transform_14(%arg0: i32) -> (i32, i32) {
    %c0_i32 = arith.constant 0 : i32
    %c0_i32_0 = arith.constant 0 : i32
    %c0_i32_1 = arith.constant 0 : i32
    return %c0_i32, %c0_i32_0 : i32, i32
  }
  func.func @transform_15(%arg0: i32) -> (i32, i32) {
    %c0_i32 = arith.constant 0 : i32
    %c0_i32_0 = arith.constant 0 : i32
    %c0_i32_1 = arith.constant 0 : i32
    return %c0_i32, %c0_i32_0 : i32, i32
  }
  func.func @transform_16(%arg0: i32) -> (i32, i32) {
    %c0_i32 = arith.constant 0 : i32
    %c0_i32_0 = arith.constant 0 : i32
    %c0_i32_1 = arith.constant 0 : i32
    return %c0_i32, %c0_i32_0 : i32, i32
  }
  func.func @transform_17(%arg0: i32) -> (i32, i32) {
    %c0_i32 = arith.constant 0 : i32
    %c0_i32_0 = arith.constant 0 : i32
    %c0_i32_1 = arith.constant 0 : i32
    return %c0_i32, %c0_i32_0 : i32, i32
  }
  func.func @transform_18(%arg0: i32) -> (i32, i32, i32) {
    %c0_i32 = arith.constant 0 : i32
    %c0_i32_0 = arith.constant 0 : i32
    %c0_i32_1 = arith.constant 0 : i32
    return %arg0, %c0_i32, %c0_i32_0 : i32, i32, i32
  }
}

</mosaic_0001>

<bundles_post_ra>
// kernel: _lambda_.1
= control target key start
LH: loop header
LB: loop body
LE: loop exit
PB: predicated region body
PF: predicated region fallthrough
CT: control target
= control target key end

     0   :  { %s5563_s0 = inlined_call_operand.vmem [shape: bf16[2,8,16], index: 0, kind: input, shape index: {}]   ;;  %s5564_s1 = inlined_call_operand.vmem [shape: bf16[2,16,64], index: 1, kind: input, shape index: {}]   ;;  %s5565_s2 = inlined_call_operand.vmem [shape: bf16[16,16], index: 2, kind: input, shape index: {}]   ;;  %s5566_s3 = inlined_call_operand.vmem [shape: bf16[16,128], index: 3, kind: input, shape index: {}]   ;;  %s5567_s4 = inlined_call_operand.vmem [shape: bf16[128,64], index: 4, kind: input, shape index: {}]   ;;  %s5568_s5 = inlined_call_operand.vmem [shape: bf16[64,32], index: 5, kind: input, shape index: {}]   ;;  %s5569_s6 = inlined_call_operand.vmem [shape: bf16[4,32,32], index: 6, kind: input, shape index: {}]   ;;  %s5570_s7 = inlined_call_operand.hbm [shape: bf16[128,64], index: 7, kind: input, shape index: {}]   ;;  %s5571_s8 = inlined_call_operand.hbm [shape: bf16[64,16], index: 8, kind: input, shape index: {}]   ;;  %s5572_s9 = inlined_call_operand.vmem [shape: bf16[576,64], index: 9, kind: input, shape index: {}]   ;;  %s5573_s10 = inlined_call_operand.hbm [shape: f32[3,64], index: 10, kind: input, shape index: {}]   ;;  %s5574_s11 = inlined_call_operand.hbm [shape: bf16[576,32], index: 11, kind: input, shape index: {}]   ;;  %s5575_s12 = inlined_call_operand.hbm [shape: f32[3,32], index: 12, kind: input, shape index: {}]   ;;  %s5576_s13 = inlined_call_operand.vmem [shape: bf16[32,16], index: 13, kind: input, shape index: {}]   ;;  %s5577_s14 = inlined_call_operand.vmem [shape: f32[1,16], index: 14, kind: input, shape index: {}]   ;;  %s5578_s15 = inlined_call_operand.hbm [shape: bf16[16,4], index: 15, kind: input, shape index: {}]   ;;  %s5579_s16 = inlined_call_operand.hbm [shape: f32[3,4], index: 16, kind: input, shape index: {}]   ;;  %s5580_s17 = inlined_call_operand.hbm [shape: f32[4,16], index: 17, kind: input, shape index: {}]   ;;  %s5581_s18 = inlined_call_operand.vmem [shape: f32[2,64,128], index: 18, kind: output, shape index: {}]  }
   0x1   :  { %5587 = sst [smem:[#allocation21_spill]] %s5563_s0 }
   0x2   :  { %5588 = sst [smem:[#allocation22_spill]] %s5564_s1 }
   0x3   :  { %5589 = sst [smem:[#allocation23_spill]] %s5565_s2 }
   0x4   :  { %5590 = sst [smem:[#allocation24_spill]] %s5572_s9 }
   0x5   :  { %5591 = sst [smem:[#allocation25_spill]] %s5576_s13 }
   0x6   :  { %5592 = sst [smem:[#allocation26_spill]] %s5577_s14 }
   0x7   :  { %5593 = sst [smem:[#allocation27_spill]] %s5581_s18 }
   0x8   :  { %23 = vsyncpa [#allocation3], 0 }
   0x9   :  { %24 = vsyncpa [#allocation5], 0 }
   0xa   :  { %25 = vsyncpa [#allocation8], 0 }
   0xb   :  { %26 = vsyncpa [#allocation11], 0 }
   0xc   :  { %27 = vsyncpa [#allocation14], 0  ;;  %s4641_s27 = smov 0  }
   0xd LB: > { %5594 = sst [smem:[#allocation20_spill]] %s4527_s27  ;;  %s4647_s28 = sadd.s32 4294967295, %s4527_s27   ;;  %s4527_s27 = sphi %s4641_s27, %s33_s27  }
   0xe   : > { %p3590_p0 = scmp.ge.s32.totalorder %s4527_s27, 1  ;;  %p452_p1 = scmp.lt.s32.totalorder %s4527_s27, 3 }
   0xf   : > { %p5585_p2 = scmp.eq.s32.totalorder %s4647_s28, 0  ;;  %s4529_s30 = smov [#allocation4]  }
  0x10   : > { %p4652_p3 = pnand %p3590_p0, %p452_p1  ;;  %s492_s0 = sshll.u32 %s4529_s30, 4  ;;  %s4656_s0 = int_to_ptr.vmem [resolvable:$true] %s492_s0 }
  0x11   : > { %s4530_s19 = smov [#allocation7]   ;;  %s4531_s21 = smov [#allocation10]  }
  0x12   : > { %s5595_s29 = scalar_select %p4652_p3, 1, 0 }
  0x13   : > { %p4050_p4 = pneg %p4652_p3  ;;  %s519_s1 = sshll.u32 %s4530_s19, 4  ;;  %s4660_s1 = int_to_ptr.vmem [resolvable:$true] %s519_s1 }
  0x14   : > { %s549_s22 = sshll.u32 %s4531_s21, 4  ;;  %s4532_s2 = smov [#allocation2]   ;;  %s4668_s22 = int_to_ptr.vmem [resolvable:$true] %s549_s22 }
  0x15   : > { %p4664_p5 = pnand %p5585_p2, %p4050_p4  ;;  %s4670_s23 = sshll.u32 %s4532_s2, 4  ;;  %s480_s23 = int_to_ptr.vmem [resolvable:$true] %s4670_s23 }
  0x16   : > { %s4277_s26 = scalar_lea.hbm %s5571_s8, 512 }
  0x17   : > { %p4278_p6 = scmp.ne.s32.totalorder %s5571_s8, %s4277_s26  ;;  %p4680_p7 = pneg %p4664_p5 }
  0x18   : > { %p4284_p10 = scmp.lt.u32.totalorder %s4277_s26, %s5571_s8 }
  0x19   : > { %p4280_p8 = pnand %p4680_p7, %p4278_p6 }
  0x1b   : > { %p4281_p9 = pneg %p4280_p8 }
  0x1d   : > { %p4286_p11 = pnand %p4284_p10, %p4281_p9 }
  0x1f   : > { %4289 = shalt.err (!%p4286_p11)
}
  0x20   : > { %s4290_s24 = scalar_lea.vmem %s4656_s0, 512  ;;  %p4298_p1 = scmp.lt.s32.totalorder %s4656_s0, %s4656_s0 }
  0x21   : > { %p4291_p12 = scmp.ne.s32.totalorder %s4656_s0, %s4290_s24  ;;  %p4299_p4 = scmp.lt.s32.totalorder %s4290_s24, %s4290_s24 }
  0x23   : > { %p4293_p13 = pnand %p4291_p12, %p4680_p7  ;;  %p4300_p6 = por %p4299_p4, %p4298_p1 }
  0x25   : > { %p4294_p0 = pneg %p4293_p13 }
  0x27   : > { %p4301_p8 = pnand %p4300_p6, %p4294_p0 }
  0x29   : > { %4304 = shalt.err (!%p4301_p8)
}
  0x2a   : > { %s4533_s25 = smov 64   ;;  %s4534_s26 = smov 4  }
  0x2b   : > { %4056 = dma.hbm_to_vmem [thread:$0]  (!%p4664_p5), %s5571_s8, 512, %s4656_s0, [#allocation5], %s4533_s25, %s4533_s25, %s4534_s26  }
  0x2c   : > { %s4305_s24 = scalar_lea.hbm %s5574_s11, 4608 }
  0x2d   : > { %p4306_p9 = scmp.ne.s32.totalorder %s5574_s11, %s4305_s24  ;;  %p4312_p12 = scmp.lt.u32.totalorder %s4305_s24, %s5574_s11 }
  0x2f   : > { %p4308_p10 = pnand %p4306_p9, %p4680_p7 }
  0x31   : > { %p4309_p11 = pneg %p4308_p10 }
  0x33   : > { %p4314_p13 = pnand %p4312_p12, %p4309_p11 }
  0x35   : > { %4317 = shalt.err (!%p4314_p13)
}
  0x36   : > { %s4318_s0 = scalar_lea.vmem %s4660_s1, 4608  ;;  %p4326_p6 = scmp.lt.s32.totalorder %s4660_s1, %s4660_s1 }
  0x37   : > { %p4319_p0 = scmp.ne.s32.totalorder %s4660_s1, %s4318_s0  ;;  %p4327_p8 = scmp.lt.s32.totalorder %s4318_s0, %s4318_s0 }
  0x39   : > { %p4321_p1 = pnand %p4319_p0, %p4680_p7  ;;  %p4328_p9 = por %p4327_p8, %p4326_p6 }
  0x3b   : > { %p4322_p4 = pneg %p4321_p1 }
  0x3d   : > { %p4329_p10 = pnand %p4328_p9, %p4322_p4 }
  0x3f   : > { %4332 = shalt.err (!%p4329_p10)
}
  0x40   : > { %4062 = dma.hbm_to_vmem [thread:$0]  (!%p4664_p5), %s5574_s11, 4608, %s4660_s1, [#allocation8], %s4533_s25, %s4533_s25, %s4534_s26  }
  0x41   : > { %s4333_s30 = scalar_lea.hbm %s5578_s15, 128 }
  0x42   : > { %p4334_p11 = scmp.ne.s32.totalorder %s5578_s15, %s4333_s30  ;;  %p4340_p0 = scmp.lt.u32.totalorder %s4333_s30, %s5578_s15 }
  0x44   : > { %p4336_p12 = pnand %p4334_p11, %p4680_p7 }
  0x46   : > { %p4337_p13 = pneg %p4336_p12 }
  0x48   : > { %p4342_p1 = pnand %p4340_p0, %p4337_p13 }
  0x4a   : > { %4345 = shalt.err (!%p4342_p1)
}
  0x4b   : > { %s4346_s1 = scalar_lea.vmem %s4668_s22, 128  ;;  %p4354_p9 = scmp.lt.s32.totalorder %s4668_s22, %s4668_s22 }
  0x4c   : > { %p4347_p4 = scmp.ne.s32.totalorder %s4668_s22, %s4346_s1  ;;  %p4355_p10 = scmp.lt.s32.totalorder %s4346_s1, %s4346_s1 }
  0x4e   : > { %p4349_p6 = pnand %p4347_p4, %p4680_p7  ;;  %p4356_p11 = por %p4355_p10, %p4354_p9 }
  0x50   : > { %p4350_p8 = pneg %p4349_p6 }
  0x52   : > { %p4357_p12 = pnand %p4356_p11, %p4350_p8 }
  0x54   : > { %4360 = shalt.err (!%p4357_p12)
}
  0x55   : > { %4068 = dma.hbm_to_vmem [thread:$0]  (!%p4664_p5), %s5578_s15, 128, %s4668_s22, [#allocation11], %s4533_s25, %s4533_s25, %s4534_s26  }
  0x56   : > { %s4361_s18 = scalar_lea.hbm %s5570_s7, 1024 }
  0x57   : > { %p4362_p13 = scmp.ne.s32.totalorder %s5570_s7, %s4361_s18  ;;  %p4368_p4 = scmp.lt.u32.totalorder %s4361_s18, %s5570_s7 }
  0x59   : > { %p4364_p0 = pnand %p4362_p13, %p4680_p7 }
  0x5b   : > { %p4365_p1 = pneg %p4364_p0 }
  0x5d   : > { %p4370_p6 = pnand %p4368_p4, %p4365_p1 }
  0x5f   : > { %4373 = shalt.err (!%p4370_p6)
}
  0x60   : > { %s4374_s24 = scalar_lea.vmem %s480_s23, 1024  ;;  %p4382_p11 = scmp.lt.s32.totalorder %s480_s23, %s480_s23 }
  0x61   : > { %p4375_p8 = scmp.ne.s32.totalorder %s480_s23, %s4374_s24  ;;  %p4383_p12 = scmp.lt.s32.totalorder %s4374_s24, %s4374_s24 }
  0x63   : > { %p4377_p9 = pnand %p4375_p8, %p4680_p7  ;;  %p4384_p2 = por %p4383_p12, %p4382_p11 }
  0x65   : > { %p4378_p10 = pneg %p4377_p9 }
  0x67   : > { %p4385_p3 = pnand %p4384_p2, %p4378_p10 }
  0x69   : > { %4388 = shalt.err (!%p4385_p3)
}
  0x6a   : > { %4053 = dma.hbm_to_vmem [thread:$0]  (!%p4664_p5), %s5570_s7, 1024, %s480_s23, [#allocation3], %s4533_s25, %s4533_s25, %s4534_s26  }
  0x6b   : > { %s4535_s0 = smov [#allocation6]   ;;  %s4536_s13 = smov [#allocation9]  }
  0x6c   : > { %s509_s9 = sshll.u32 %s4535_s0, 4  ;;  %s533_s14 = sshll.u32 %s4536_s13, 4  ;;  %s510_s9 = int_to_ptr.vmem [resolvable:$true] %s509_s9  ;;  %s534_s14 = int_to_ptr.vmem [resolvable:$true] %s533_s14 }
  0x6d   : > { %s4389_s19 = scalar_lea.hbm %s5573_s10, 64 }
  0x6e   : > { %p4390_p2 = scmp.ne.s32.totalorder %s5573_s10, %s4389_s19  ;;  %p4396_p0 = scmp.lt.u32.totalorder %s4389_s19, %s5573_s10 }
  0x70   : > { %p4392_p3 = pnand %p4390_p2, %p4680_p7 }
  0x72   : > { %p4393_p13 = pneg %p4392_p3 }
  0x74   : > { %p4398_p1 = pnand %p4396_p0, %p4393_p13 }
  0x76   : > { %4401 = shalt.err (!%p4398_p1)
}
  0x77   : > { %s4402_s23 = scalar_lea.vmem %s510_s9, 64  ;;  %p4410_p9 = scmp.lt.s32.totalorder %s510_s9, %s510_s9 }
  0x78   : > { %p4403_p4 = scmp.ne.s32.totalorder %s510_s9, %s4402_s23  ;;  %p4411_p10 = scmp.lt.s32.totalorder %s4402_s23, %s4402_s23 }
  0x7a   : > { %p4405_p6 = pnand %p4403_p4, %p4680_p7  ;;  %p4412_p11 = por %p4411_p10, %p4410_p9 }
  0x7c   : > { %p4406_p8 = pneg %p4405_p6 }
  0x7e   : > { %p4413_p12 = pnand %p4412_p11, %p4406_p8 }
  0x80   : > { %4416 = shalt.err (!%p4413_p12)
}
  0x81   : > { %4059 = dma.hbm_to_vmem [thread:$0]  (!%p4664_p5), %s5573_s10, 64, %s510_s9, [#allocation5]  }
  0x82   : > { %s4417_s13 = scalar_lea.hbm %s5575_s12, 64 }
  0x83   : > { %p4418_p2 = scmp.ne.s32.totalorder %s5575_s12, %s4417_s13  ;;  %p4424_p0 = scmp.lt.u32.totalorder %s4417_s13, %s5575_s12 }
  0x85   : > { %p4420_p3 = pnand %p4418_p2, %p4680_p7 }
  0x87   : > { %p4421_p13 = pneg %p4420_p3 }
  0x89   : > { %p4426_p1 = pnand %p4424_p0, %p4421_p13 }
  0x8b   : > { %4429 = shalt.err (!%p4426_p1)
}
  0x8c   : > { %s4430_s2 = scalar_lea.vmem %s534_s14, 64  ;;  %p4438_p9 = scmp.lt.s32.totalorder %s534_s14, %s534_s14 }
  0x8d   : > { %p4431_p4 = scmp.ne.s32.totalorder %s534_s14, %s4430_s2  ;;  %p4439_p10 = scmp.lt.s32.totalorder %s4430_s2, %s4430_s2 }
  0x8f   : > { %p4433_p6 = pnand %p4431_p4, %p4680_p7  ;;  %p4440_p11 = por %p4439_p10, %p4438_p9 }
  0x91   : > { %p4434_p8 = pneg %p4433_p6 }
  0x93   : > { %p4441_p12 = pnand %p4440_p11, %p4434_p8 }
  0x95   : > { %4444 = shalt.err (!%p4441_p12)
}
  0x96   : > { %4065 = dma.hbm_to_vmem [thread:$0]  (!%p4664_p5), %s5575_s12, 64, %s534_s14, [#allocation8]  }
  0x97   : > { %s4537_s22 = smov [#allocation12]   ;;  %s4538_s25 = smov [#allocation13]  }
  0x98   : > { %s563_s23 = sshll.u32 %s4537_s22, 4  ;;  %s574_s26 = sshll.u32 %s4538_s25, 4  ;;  %s564_s23 = int_to_ptr.vmem [resolvable:$true] %s563_s23  ;;  %s575_s26 = int_to_ptr.vmem [resolvable:$true] %s574_s26 }
  0x99   : > { %s4445_s13 = scalar_lea.hbm %s5579_s16, 64 }
  0x9a   : > { %p4446_p2 = scmp.ne.s32.totalorder %s5579_s16, %s4445_s13  ;;  %p4452_p0 = scmp.lt.u32.totalorder %s4445_s13, %s5579_s16 }
  0x9c   : > { %p4448_p3 = pnand %p4446_p2, %p4680_p7 }
  0x9e   : > { %p4449_p13 = pneg %p4448_p3 }
  0xa0   : > { %p4454_p1 = pnand %p4452_p0, %p4449_p13 }
  0xa2   : > { %4457 = shalt.err (!%p4454_p1)
}
  0xa3   : > { %s4458_s14 = scalar_lea.vmem %s564_s23, 64  ;;  %p4466_p9 = scmp.lt.s32.totalorder %s564_s23, %s564_s23 }
  0xa4   : > { %p4459_p4 = scmp.ne.s32.totalorder %s564_s23, %s4458_s14  ;;  %p4467_p10 = scmp.lt.s32.totalorder %s4458_s14, %s4458_s14 }
  0xa6   : > { %p4461_p6 = pnand %p4459_p4, %p4680_p7  ;;  %p4468_p11 = por %p4467_p10, %p4466_p9 }
  0xa8   : > { %p4462_p8 = pneg %p4461_p6 }
  0xaa   : > { %p4469_p12 = pnand %p4468_p11, %p4462_p8 }
  0xac   : > { %4472 = shalt.err (!%p4469_p12)
}
  0xad   : > { %4071 = dma.hbm_to_vmem [thread:$0]  (!%p4664_p5), %s5579_s16, 64, %s564_s23, [#allocation11]  }
  0xae   : > { %s4473_s25 = scalar_lea.hbm %s5580_s17, 64 }
  0xaf   : > { %p4474_p2 = scmp.ne.s32.totalorder %s5580_s17, %s4473_s25  ;;  %p4480_p0 = scmp.lt.u32.totalorder %s4473_s25, %s5580_s17 }
  0xb1   : > { %p4476_p3 = pnand %p4474_p2, %p4680_p7 }
  0xb3   : > { %p4477_p13 = pneg %p4476_p3 }
  0xb5   : > { %p4482_p1 = pnand %p4480_p0, %p4477_p13 }
  0xb7   : > { %4485 = shalt.err (!%p4482_p1)
}
  0xb8   : > { %s4486_s30 = scalar_lea.vmem %s575_s26, 64  ;;  %p4494_p9 = scmp.lt.s32.totalorder %s575_s26, %s575_s26 }
  0xb9   : > { %p4487_p4 = scmp.ne.s32.totalorder %s575_s26, %s4486_s30  ;;  %p4495_p10 = scmp.lt.s32.totalorder %s4486_s30, %s4486_s30 }
  0xbb   : > { %p4489_p6 = pnand %p4487_p4, %p4680_p7  ;;  %p4496_p11 = por %p4495_p10, %p4494_p9 }
  0xbd   : > { %p4490_p8 = pneg %p4489_p6 }
  0xbf   : > { %p4497_p12 = pnand %p4496_p11, %p4490_p8 }
  0xc1   : > { %4500 = shalt.err (!%p4497_p12)
}
  0xc2   : > { %4074 = dma.hbm_to_vmem [thread:$0]  (!%p4664_p5), %s5580_s17, 64, %s575_s26, [#allocation14]  }
  0xc3   : > { %p5598_p2 = scmp.ne.s32.totalorder %s5595_s29, 0 }
  0xc4   : > { %p5599_p3 = scmp.eq.s32.totalorder (!%p5598_p2), %s4647_s28, 0 }
  0xc5   : > { %602 = sbr.rel (%p5598_p2) target bundleno = 4022 (0xfb6), region = 92 }
  0xcc   : > { %4506 = dma.done.wait (%p5599_p3), [#allocation3], 1024   ;;  %p5600_p7 = pmov %p5599_p3 }
  0xcd   : > { %p5601_p13 = pmov %p5599_p3 }
  0xce   : > { %4508 = vsyncadd (%p5600_p7), [#allocation3], 4294966272 }
  0xcf   : > { %4510 = dma.done.wait (%p5601_p13), [#allocation5], 576   ;;  %p5602_p0 = pmov %p5599_p3 }
  0xd1   : > { %4512 = vsyncadd (%p5602_p0), [#allocation5], 4294966720  ;;  %p5603_p1 = pmov %p5602_p0 }
  0xd2   : > { %p5604_p5 = pmov %p5602_p0 }
  0xd3   : > { %4514 = dma.done.wait (%p5603_p1), [#allocation8], 4672  }
  0xd4   : > { %4516 = vsyncadd (%p5604_p5), [#allocation8], 4294962624  ;;  %p5605_p4 = pmov %p5602_p0 }
  0xd5   : > { %p5606_p6 = pmov %p5602_p0 }
  0xd6   : > { %4518 = dma.done.wait (%p5605_p4), [#allocation11], 192  }
  0xd7   : > { %4520 = vsyncadd (%p5606_p6), [#allocation11], 4294967104  ;;  %p5607_p8 = pmov %p5602_p0 }
  0xd8   : > { %p5608_p9 = pmov %p5602_p0 }
  0xd9   : > { %4522 = dma.done.wait (%p5607_p8), [#allocation14], 64  }
  0xda   : > { %4524 = vsyncadd (%p5608_p9), [#allocation14], 4294967232  ;;  %p688_p10 = scmp.lt.s32.totalorder %s4647_s28, 1  ;;  %v4539_v0 = vmov 0.0   ;;  %vm4540_vm0 = vmmov 0   ;;  %s5609_s26 = sld [smem:[#allocation21_spill]] }
  0xdb   : > { %3874 = vmatprep.subr.bf16.mxu0 %v4539_v0  ;;  %3876 = vmatprep.mubr.msk.bf16.mxu0 %vm4540_vm0, %v4539_v0  ;;  %s5610_s9 = sld [smem:[#allocation23_spill]]  ;;  %vm712_vm1 = vcmask 130048   ;;  %v4132_v3 = vld [vmem:[%s5566_s3] sm:$0xff]   ;;  %s5611_s13 = sld [smem:[#allocation22_spill]]  ;;  %v4139_v5 = vld [vmem:[%s5567_s4 + $0x8] sm:$0xff]   ;;  %v4140_v6 = vld [vmem:[%s5567_s4 + $0x10] sm:$0xff]  }
  0xdc   : > { %s5624_s28 = smov (!%p688_p10, %s4647_s28), 1  ;;  %3880 = vmatprep.subr.bf16.mxu1 %v4539_v0  ;;  %3882 = vmatprep.mubr.msk.bf16.mxu1 %vm4540_vm0, %v4539_v0  ;;  %v4138_v4 = vld [vmem:[%s5567_s4] sm:$0xff]   ;;  %v4141_v7 = vld [vmem:[%s5567_s4 + $0x18] sm:$0xff]   ;;  %v4143_v9 = vld [vmem:[%s5567_s4 + $0x28] sm:$0xff]   ;;  %vm961_vm2 = vcmask 523264   ;;  %vm1023_vm3 = vcmask 261120  }
  0xdd   : > { %s3609_s27 = sshll.u32 %s5624_s28, 2  ;;  %3881 = vmatpush3.bf16.msra.mxu1 %v4132_v3  ;;  %s3808_s25 = sshll.u32 %s5624_s28, 3  ;;  %v4142_v8 = vld [vmem:[%s5567_s4 + $0x20] sm:$0xff]   ;;  %v4144_v10 = vld [vmem:[%s5567_s4 + $0x30] sm:$0xff]   ;;  %v4134_v18 = vld [vmem:[%s5568_s5 + $0x8] sm:$0xff]   ;;  %vm1290_vm4 = vcmask 785408  }
  0xde   : > { %3906 = vmatprep.subr.bf16.mxu1 %v4539_v0  ;;  %v4133_v15 = vld [vmem:[%s5568_s5] sm:$0xff]   ;;  %v4135_v19 = vld [vmem:[%s5568_s5 + $0x10] sm:$0xff]   ;;  %v4136_v20 = vld [vmem:[%s5568_s5 + $0x18] sm:$0xff]   ;;  %s4541_s23 = smov 32   ;;  %s5612_s2 = sld [smem:[#allocation24_spill]]  ;;  %vm1463_vm9 = vcmask 1047552  }
  0xdf   : > { %v4145_v22 = vld [vmem:[%s5567_s4 + $0x38] sm:$0xff]   ;;  %v4146_v23 = vld [vmem:[%s5569_s6] sm:$0xff]   ;;  %v4147_v24 = vld [vmem:[%s5569_s6 + $0x8] sm:$0xff]   ;;  %vm1464_vm10 = vsmask.f32 7424  ;;  %vm1455_vm11 = vcmask 1040384  }
  0xe0   : > { %s691_s21 = scalar_lea.vmem %s5609_s26, %s3609_s27  ;;  %v4148_v36 = vld [vmem:[%s5569_s6 + $0x10] sm:$0xff]   ;;  %v4149_v37 = vld [vmem:[%s5569_s6 + $0x18] sm:$0xff]   ;;  %v4150_v49 = vld [vmem:[%s5569_s6 + $0x20] sm:$0xff]   ;;  %s4542_s26 = smov 64   ;;  %vm1456_vm12 = vsmask.f32 256 }
  0xe1   : > { %v4131_v1 = vld [vmem:[%s5610_s9] sm:$0xff]   ;;  %s4901_s18 = scalar_lea.vmem %s5611_s13, %s3808_s25  ;;  %v4151_v50 = vld [vmem:[%s5569_s6 + $0x28] sm:$0xff]   ;;  %v4152_v59 = vld [vmem:[%s5569_s6 + $0x30] sm:$0xff]   ;;  %vm1479_vm15 = vcmask 1041408   ;;  %s5619_s30 = sld [smem:[#allocation25_spill]] }
  0xe2   : > { %v703_v2 = vld [vmem:[%s691_s21] sm:$0xf]  ;;  %3875 = vmatpush3.bf16.msra.mxu0 %v4131_v1  ;;  %v4153_v60 = vld [vmem:[%s5569_s6 + $0x38] sm:$0xff]   ;;  %s4543_s21 = smov 96   ;;  %vm5158_vm13 = vmand %vm1463_vm9, %vm1464_vm10  ;;  %s5620_s20 = sld [smem:[#allocation26_spill]] }
  0xe3   : > { %3886 = vmatprep.subr.bf16.mxu0 %v4539_v0  ;;  %v4137_v21 = vld [vmem:[%s4901_s18] sm:$0xff]   ;;  %vm5163_vm14 = vmand %vm1455_vm11, %vm1456_vm12  ;;  %s3809_s14 = sshll.u32 %s5624_s28, 6  ;;  %s5621_s24 = sld [smem:[#allocation27_spill]] }
  0xe5   : > { %3877 = vmatmul.mubr.msk.bf16.vlgmr.msra.gmra.mrb[0].mxu0 %vm712_vm1, %v703_v2 }
  0xe6   : > { %3902 = vmatprep.mubr.msk.bf16.mxu0 %vm4540_vm0, %v4539_v0  ;;  %3887 = vmatpush3.bf16.msra.mxu0 %v4138_v4 }
  0xe7   : > { %3888 = vmatprep.subr.bf16.mxu0 %v4539_v0 }
  0xe9   : > { %s5534_s22 = scalar_lea.vmem %s5621_s24, %s3809_s14 }
  0xea   : > { %3889 = vmatpush3.bf16.msra.mxu0 %v4139_v5 }
  0xeb   : > { %3890 = vmatprep.subr.bf16.mxu0 %v4539_v0 }
  0xee   : > { %3891 = vmatpush3.bf16.msra.mxu0 %v4140_v6  ;;  %v4154_v6 = vld [vmem:[#allocation2] sm:$0xff]  }
  0xef   : > { %3892 = vmatprep.subr.bf16.mxu0 %v4539_v0 }
  0xf2   : > { %3893 = vmatpush3.bf16.msra.mxu0 %v4141_v7  ;;  %v4155_v7 = vld [vmem:[#allocation2 + $0x8] sm:$0xff]  }
  0xf3   : > { %3894 = vmatprep.subr.bf16.mxu0 %v4539_v0 }
  0xf6   : > { %3895 = vmatpush3.bf16.msra.mxu0 %v4142_v8  ;;  %v4156_v8 = vld [vmem:[#allocation2 + $0x10] sm:$0xff]  }
  0xf7   : > { %3896 = vmatprep.subr.bf16.mxu0 %v4539_v0 }
  0xfa   : > { %3897 = vmatpush3.bf16.msra.mxu0 %v4143_v9  ;;  %v4157_v9 = vld [vmem:[#allocation2 + $0x18] sm:$0xff]  }
  0xfb   : > { %3898 = vmatprep.subr.bf16.mxu0 %v4539_v0 }
  0xfe   : > { %3899 = vmatpush3.bf16.msra.mxu0 %v4144_v10  ;;  %v4158_v10 = vld [vmem:[#allocation2 + $0x20] sm:$0xff]  }
  0xff   : > { %3900 = vmatprep.subr.bf16.mxu0 %v4539_v0 }
 0x102   : > { %3901 = vmatpush3.bf16.msra.mxu0 %v4145_v22 }
 0x103   : > { %3934 = vmatprep.subr.bf16.mxu0 %v4539_v0 }
 0x1b8   : > { %v750_v11 = vpop.f32.mrb[0].mxu0 }
 0x1b9   : > { %v756_v12 = vmax.f32 %v750_v11, 0.0  ;;  %v3878_v13 = vpop.f32.mrb[1].mxu0  ;;  %v4159_v11 = vld [vmem:[#allocation2 + $0x28] sm:$0xff]  }
 0x1ba   : > { %v753_v14 = vpop.f32.mrb[2].mxu0  ;;  %v4161_v13 = vld [vmem:[#allocation2 + $0x38] sm:$0xff]  }
 0x1bb   : > { %v757_v16 = vpack.c.bf16 %v756_v12, %v756_v12  ;;  %v3879_v17 = vpop.f32.mrb[3].mxu0  ;;  %v4160_v12 = vld [vmem:[#allocation2 + $0x30] sm:$0xff]  }
 0x1bd   : > { %3883 = vmatmul.mubr.msk.bf16.vlgmr.msra.gmra.mrb[0].mxu1 %vm712_vm1, %v757_v16 }
 0x1be   : > { %3907 = vmatpush3.bf16.msra.mxu1 %v4133_v15  ;;  %3914 = vmatprep.mubr.msk.bf16.mxu1 %vm4540_vm0, %v4539_v0 }
 0x1bf   : > { %3908 = vmatprep.subr.bf16.mxu1 %v4539_v0 }
 0x1c2   : > { %3909 = vmatpush3.bf16.msra.mxu1 %v4134_v18 }
 0x1c3   : > { %3910 = vmatprep.subr.bf16.mxu1 %v4539_v0 }
 0x1c6   : > { %3911 = vmatpush3.bf16.msra.mxu1 %v4135_v19 }
 0x1c7   : > { %3912 = vmatprep.subr.bf16.mxu1 %v4539_v0 }
 0x1ca   : > { %3913 = vmatpush3.bf16.msra.mxu1 %v4136_v20 }
 0x1cb   : > { %3918 = vmatprep.subr.bf16.mxu1 %v4539_v0 }
 0x1cd   : > { %3915 = vmatmul.mubr.msk.bf16.vlgmr.msra.gmra.mrb[4].mxu1 %vm961_vm2, %v4137_v21 }
 0x1ce   : > { %3922 = vmatprep.mubr.msk.bf16.mxu1 %vm4540_vm0, %v4539_v0  ;;  %3919 = vmatpush3.bf16.msra.mxu1 %v4146_v23 }
 0x1cf   : > { %3920 = vmatprep.subr.bf16.mxu1 %v4539_v0 }
 0x1d2   : > { %3921 = vmatpush3.bf16.msra.mxu1 %v4147_v24 }
 0x1d3   : > { %3926 = vmatprep.subr.bf16.mxu1 %v4539_v0 }
 0x290   : > { %v803_v25 = vpop.f32.mrb[0].mxu1 }
 0x291   : > { %v809_v26 = vmax.f32 %v803_v25, 0.0  ;;  %v3884_v27 = vpop.f32.mrb[1].mxu1 }
 0x292   : > { %v806_v28 = vpop.f32.mrb[2].mxu1 }
 0x293   : > { %v810_v29 = vpack.c.bf16 %v809_v26, %v809_v26  ;;  %v3885_v30 = vpop.f32.mrb[3].mxu1 }
 0x295   : > { %3903 = vmatmul.mubr.bf16.vlgmr.msra.gmra.mrb[4].mxu0 %v810_v29 }
 0x296   : > { %3938 = vmatprep.mubr.msk.bf16.mxu0 %vm4540_vm0, %v4539_v0  ;;  %3935 = vmatpush3.bf16.msra.mxu0 %v4150_v49  ;;  %v4164_v49 = vld [vmem:[%s5612_s2 + $0x68] sm:$0xff]  }
 0x297   : > { %3936 = vmatprep.subr.bf16.mxu0 %v4539_v0 }
 0x29a   : > { %3937 = vmatpush3.bf16.msra.mxu0 %v4151_v50  ;;  %v4165_v50 = vld [vmem:[%s5612_s2 + $0x8] sm:$0xff]  }
 0x29b   : > { %3950 = vmatprep.subr.bf16.mxu0 %v4539_v0 }
 0x2a0   : > { %v999_v31 = vpop.f32.mrb[4].mxu1 }
 0x2a1   : > { %v3916_v32 = vpop.f32.mrb[5].mxu1 }
 0x2a2   : > { %v1002_v33 = vpop.f32.mrb[6].mxu1 }
 0x2a3   : > { %v1006_v34 = vpack.c.bf16 %v1002_v33, %v999_v31  ;;  %v3917_v35 = vpop.f32.mrb[7].mxu1 }
 0x2a5   : > { %3923 = vmatmul.mubr.msk.bf16.vlgmr.msra.gmra.mrb[8].mxu1 %vm1023_vm3, %v1006_v34 }
 0x2a6   : > { %3930 = vmatprep.mubr.msk.bf16.mxu1 %vm4540_vm0, %v4539_v0  ;;  %3927 = vmatpush3.bf16.msra.mxu1 %v4148_v36 }
 0x2a7   : > { %3928 = vmatprep.subr.bf16.mxu1 %v4539_v0 }
 0x2aa   : > { %3929 = vmatpush3.bf16.msra.mxu1 %v4149_v37  ;;  %v1399_v37 = vlaneseq }
 0x2ab   : > { %3942 = vmatprep.subr.bf16.mxu1 %v4539_v0 }
 0x368   : > { %v4979_v38 = vpop.f32.mrb[4].mxu0 }
 0x369   : > { %v3904_v39 = vpop.f32.mrb[5].mxu0 }
 0x36a   : > { %v912_v40 = vpop.f32.mrb[6].mxu0  ;;  %v5029_v39 = vshrl.u32 %v1399_v37, 7 }
 0x36b   : > { %v3905_v41 = vpop.f32.mrb[7].mxu0 }
 0x36c   : > { %v5032_v40 = vadd.s32 8, %v5029_v39  ;;  %v1413_v41 = vand.u32 3, %v5029_v39 }
 0x36e   : > { %vm1433_vm5 = vcmp.ne.s32.totalorder %v1413_v41, 0  ;;  %vm1440_vm7 = vcmp.ne.s32.totalorder %v1413_v41, 3 }
 0x378   : > { %v4981_v42 = vpop.f32.mrb[8].mxu1 }
 0x379   : > { %v3924_v43 = vpop.f32.mrb[9].mxu1  ;;  %v1068_v45 = vmax.f32 %v4981_v42, 0.0  ;;  %v1420_v42 = vand.u32 3, %v5032_v40 }
 0x37a   : > { %v4983_v44 = vpop.f32.mrb[10].mxu1  ;;  %v5041_v43 = vsel %vm1433_vm5, 1.0, %v4539_v0 }
 0x37b   : > { %v1069_v46 = vmax.f32 %v4983_v44, 0.0  ;;  %v3925_v47 = vpop.f32.mrb[11].mxu1  ;;  %vm1434_vm6 = vcmp.ne.s32.totalorder %v1420_v42, 0  ;;  %vm1441_vm8 = vcmp.ne.s32.totalorder %v1420_v42, 3 }
 0x37c   : > { %v5044_v44 = vsel %vm1434_vm6, 1.0, %v4539_v0  ;;  %v4163_v47 = vld [vmem:[%s5612_s2] sm:$0xff]  }
 0x37d   : > { %v1070_v48 = vpack.c.bf16 %v1069_v46, %v1068_v45 }
 0x37f   : > { %3931 = vmatmul.mubr.msk.bf16.vlgmr.msra.gmra.mrb[12].mxu1 %vm1023_vm3, %v1070_v48  ;;  %v4544_v48 = vmov 0  }
 0x380   : > { %3946 = vmatprep.mubr.msk.bf16.mxu1 %vm4540_vm0, %v4539_v0  ;;  %3943 = vmatpush3.bf16.msra.mxu1 %v4152_v59  ;;  %v4174_v59 = vld [vmem:[%s5612_s2 + $0x90] sm:$0xff]  }
 0x381   : > { %3944 = vmatprep.subr.bf16.mxu1 %v4539_v0 }
 0x384   : > { %3945 = vmatpush3.bf16.msra.mxu1 %v4153_v60  ;;  %v4175_v60 = vld [vmem:[%s5612_s2 + $0x30] sm:$0xff]  }
 0x385   : > { %1609 = vmatprep.subr.bf16.mxu1 %v4544_v48 }
 0x452   : > { %v1125_v51 = vpop.f32.mrb[12].mxu1 }
 0x453   : > { %v3932_v52 = vpop.f32.mrb[13].mxu1  ;;  %v1132_v54 = vmax.f32 %v1125_v51, 0.0  ;;  %v4166_v51 = vld [vmem:[%s5612_s2 + $0x70] sm:$0xff]  }
 0x454   : > { %v1128_v53 = vpop.f32.mrb[14].mxu1  ;;  %v4167_v52 = vld [vmem:[%s5612_s2 + $0x10] sm:$0xff]  }
 0x455   : > { %v1133_v55 = vmax.f32 %v1128_v53, 0.0  ;;  %v3933_v56 = vpop.f32.mrb[15].mxu1  ;;  %v4168_v53 = vld [vmem:[%s5612_s2 + $0x78] sm:$0xff]  }
 0x456   : > { %v4171_v56 = vld [vmem:[%s5612_s2 + $0x20] sm:$0xff]  }
 0x457   : > { %v1134_v57 = vpack.c.bf16 %v1133_v55, %v1132_v54  ;;  %v4116_v58 = vpack.i.bf16 %v1133_v55, %v1132_v54  ;;  %v4169_v54 = vld [vmem:[%s5612_s2 + $0x18] sm:$0xff]   ;;  %v4170_v55 = vld [vmem:[%s5612_s2 + $0x80] sm:$0xff]  }
 0x459   : > { %4117 = vrot.lane.b32.xlu0 %v4116_v58, %s4541_s23  ;;  %3939 = vmatmul.mubr.msk.bf16.vlgmr.msra.gmra.mrb[8].mxu0 %vm1023_vm3, %v1134_v57  ;;  %v4172_v57 = vld [vmem:[%s5612_s2 + $0x88] sm:$0xff]  }
 0x45a   : > { %3966 = vmatprep.mubr.msk.bf16.mxu0 %vm4540_vm0, %v4539_v0  ;;  %3951 = vmatpush3.bf16.msra.mxu0 %v4154_v6  ;;  %v4173_v58 = vld [vmem:[%s5612_s2 + $0x28] sm:$0xff]   ;;  %v4184_v6 = vld [vmem:[%s5612_s2 + $0xb8] sm:$0xff]   ;;  %vm1767_vm0 = vcmask 1045504  }
 0x45b   : > { %3952 = vmatprep.subr.bf16.mxu0 %v4539_v0 }
 0x45e   : > { %3953 = vmatpush3.bf16.msra.mxu0 %v4155_v7  ;;  %v915_v7 = vsub.f32 0.0, %v4979_v38 }
 0x45f   : > { %3954 = vmatprep.subr.bf16.mxu0 %v4539_v0 }
 0x462   : > { %3955 = vmatpush3.bf16.msra.mxu0 %v4156_v8  ;;  %v916_v8 = vmul.f32 1.442695, %v915_v7 }
 0x463   : > { %3956 = vmatprep.subr.bf16.mxu0 %v4539_v0 }
 0x464   : > { %4241 = vpow2.f32 %v916_v8 }
 0x466   : > { %3957 = vmatpush3.bf16.msra.mxu0 %v4157_v9 }
 0x467   : > { %3958 = vmatprep.subr.bf16.mxu0 %v4539_v0 }
 0x46a   : > { %3959 = vmatpush3.bf16.msra.mxu0 %v4158_v10 }
 0x46b   : > { %3960 = vmatprep.subr.bf16.mxu0 %v4539_v0 }
 0x46e   : > { %3961 = vmatpush3.bf16.msra.mxu0 %v4159_v11  ;;  %v4242_v9 = vpop.eup %4241 }
 0x46f   : > { %3962 = vmatprep.subr.bf16.mxu0 %v4539_v0  ;;  %v918_v10 = vadd.f32 1.0, %v4242_v9  ;;  %v1914_v9 = vld [vmem:[#allocation6] sm:$0x7] }
 0x471   : > { %4243 = vrcp.f32 %v918_v10 }
 0x472   : > { %3963 = vmatpush3.bf16.msra.mxu0 %v4160_v12  ;;  %v4185_v12 = vld [vmem:[%s5612_s2 + $0x58] sm:$0xff]  }
 0x473   : > { %3964 = vmatprep.subr.bf16.mxu0 %v4539_v0 }
 0x476   : > { %3965 = vmatpush3.bf16.msra.mxu0 %v4161_v13 }
 0x477   : > { %1724 = vmatprep.subr.bf16.mxu0 %v4544_v48 }
 0x47b   : > { %v4244_v11 = vpop.eup %4243 }
 0x47c   : > { %v921_v13 = vadd.f32 1.0, %v4244_v11 }
 0x4cb   : > { %v4118_v21 = vpop.permute.xlu0 %4117 }
 0x4cc   : > { %v4120_v23 = vunpack.i.h.bf16 %v4118_v21  ;;  %v4119_v24 = vunpack.i.l.bf16 %v4118_v21 }
 0x4ce   : > { %v1287_v28 = vsel %vm1023_vm3, %v1069_v46, %v4120_v23  ;;  %v1286_v29 = vsel %vm1023_vm3, %v1068_v45, %v4119_v24  ;;  %v1439_v45 = vpack.c.bf16 %v5044_v44, %v5041_v43  ;;  %v4162_v46 = vld [vmem:[%s5612_s2 + $0x60] sm:$0xff]   ;;  %v3667_v23 = vsel %vm1441_vm8, 1.0, %v4539_v0  ;;  %v4187_v44 = vld [vmem:[%s5612_s2 + $0xc8] sm:$0xff]  }
 0x52c   : > { %v1189_v61 = vpop.f32.mrb[8].mxu0 }
 0x52d   : > { %v3940_v62 = vpop.f32.mrb[9].mxu0  ;;  %v1196_v1 = vmax.f32 %v1189_v61, 0.0  ;;  %v4176_v61 = vld [vmem:[%s5612_s2 + $0x98] sm:$0xff]  }
 0x52e   : > { %v1192_v63 = vpop.f32.mrb[10].mxu0  ;;  %v4177_v62 = vld [vmem:[%s5612_s2 + $0x38] sm:$0xff]  }
 0x52f   : > { %v1197_v2 = vmax.f32 %v1192_v63, 0.0  ;;  %v3941_v3 = vpop.f32.mrb[11].mxu0  ;;  %v4178_v63 = vld [vmem:[%s5612_s2 + $0xa0] sm:$0xff]  }
 0x530   : > { %v4181_v3 = vld [vmem:[%s5612_s2 + $0x48] sm:$0xff]  }
 0x531   : > { %v4121_v4 = vpack.i.bf16 %v1197_v2, %v1196_v1  ;;  %v1198_v5 = vpack.c.bf16 %v1197_v2, %v1196_v1  ;;  %v4179_v1 = vld [vmem:[%s5612_s2 + $0x40] sm:$0xff]   ;;  %v4180_v2 = vld [vmem:[%s5612_s2 + $0xa8] sm:$0xff]  }
 0x533   : > { %4122 = vrot.lane.b32.xlu0 %v4121_v4, %s4542_s26  ;;  %3947 = vmatmul.mubr.msk.bf16.vlgmr.msra.gmra.mrb[16].mxu1 %vm1023_vm3, %v1198_v5  ;;  %v4182_v4 = vld [vmem:[%s5612_s2 + $0xb0] sm:$0xff]  }
 0x534   : > { %1610 = vmatpush1.bf16.msra.mxu1 %v4162_v46  ;;  %v4183_v5 = vld [vmem:[%s5612_s2 + $0x50] sm:$0xff]   ;;  %v4186_v46 = vld [vmem:[%s5612_s2 + $0xc0] sm:$0xff]  }
 0x535   : > { %1611 = vmatprep.subr.bf16.mxu1 %v4544_v48 }
 0x538   : > { %1612 = vmatpush1.bf16.msra.mxu1 %v4164_v49 }
 0x539   : > { %1613 = vmatprep.subr.bf16.mxu1 %v4544_v48 }
 0x53c   : > { %1614 = vmatpush1.bf16.msra.mxu1 %v4166_v51  ;;  %v4189_v51 = vld [vmem:[%s5612_s2 + $0xd8] sm:$0xff]  }
 0x53d   : > { %1615 = vmatprep.subr.bf16.mxu1 %v4544_v48 }
 0x540   : > { %1616 = vmatpush1.bf16.msra.mxu1 %v4168_v53  ;;  %v4191_v53 = vld [vmem:[%s5612_s2 + $0xe8] sm:$0xff]  }
 0x541   : > { %1617 = vmatprep.subr.bf16.mxu1 %v4544_v48 }
 0x544   : > { %1618 = vmatpush1.bf16.msra.mxu1 %v4170_v55  ;;  %v4193_v55 = vld [vmem:[%s5612_s2 + $0xf8] sm:$0xff]  }
 0x545   : > { %1619 = vmatprep.subr.bf16.mxu1 %v4544_v48 }
 0x548   : > { %1620 = vmatpush1.bf16.msra.mxu1 %v4172_v57  ;;  %v4195_v57 = vld [vmem:[%s5612_s2 + $0x108] sm:$0xff]  }
 0x549   : > { %1621 = vmatprep.subr.bf16.mxu1 %v4544_v48 }
 0x54c   : > { %1622 = vmatpush1.bf16.msra.mxu1 %v4174_v59  ;;  %v4197_v59 = vld [vmem:[%s5612_s2 + $0x118] sm:$0xff]  }
 0x54d   : > { %1623 = vmatprep.subr.bf16.mxu1 %v4544_v48 }
 0x550   : > { %1624 = vmatpush1.bf16.msra.mxu1 %v4176_v61  ;;  %v4198_v61 = vld [vmem:[#allocation4] sm:$0xff]  }
 0x551   : > { %1625 = vmatprep.subr.bf16.mxu1 %v4544_v48 }
 0x554   : > { %1626 = vmatpush1.bf16.msra.mxu1 %v4178_v63 }
 0x555   : > { %1627 = vmatprep.subr.bf16.mxu1 %v4544_v48 }
 0x558   : > { %1628 = vmatpush1.bf16.msra.mxu1 %v4180_v2 }
 0x559   : > { %1629 = vmatprep.subr.bf16.mxu1 %v4544_v48 }
 0x55c   : > { %1630 = vmatpush1.bf16.msra.mxu1 %v4182_v4 }
 0x55d   : > { %1631 = vmatprep.subr.bf16.mxu1 %v4544_v48 }
 0x560   : > { %1632 = vmatpush1.bf16.msra.mxu1 %v4184_v6 }
 0x561   : > { %1871 = vmatprep.subr.bf16.mxu1 %v4544_v48 }
 0x5a5   : > { %v4123_v22 = vpop.permute.xlu0 %4122 }
 0x5a6   : > { %v4125_v25 = vunpack.i.h.bf16 %v4123_v22  ;;  %v4124_v26 = vunpack.i.l.bf16 %v4123_v22  ;;  %v3666_v22 = vsel %vm1440_vm7, 1.0, %v4539_v0 }
 0x5a8   : > { %v1289_v32 = vsel %vm961_vm2, %v1287_v28, %v4125_v25  ;;  %v1288_v33 = vsel %vm961_vm2, %v1286_v29, %v4124_v26  ;;  %v1446_v29 = vpack.c.bf16 %v3667_v23, %v3666_v22 }
 0x606   : > { %v1253_v14 = vpop.f32.mrb[16].mxu1 }
 0x607   : > { %v3948_v15 = vpop.f32.mrb[17].mxu1  ;;  %v1260_v17 = vmax.f32 %v1253_v14, 0.0  ;;  %v5147_v14 = vsub.s32 0, %v5029_v39 }
 0x608   : > { %v1256_v16 = vpop.f32.mrb[18].mxu1 }
 0x609   : > { %v1261_v18 = vmax.f32 %v1256_v16, 0.0  ;;  %v3949_v19 = vpop.f32.mrb[19].mxu1  ;;  %v1402_v15 = vrot.slane %v921_v13, %v5147_v14  ;;  %v1918_v10 = vrot.slane %v1914_v9, %v5147_v14 }
 0x60b   : > { %v4126_v20 = vpack.i.bf16 %v1261_v18, %v1260_v17 }
 0x60d   : > { %4127 = vrot.lane.b32.xlu1 %v4126_v20, %s4543_s21  ;;  %s4545_s21 = smov 4  }
 0x67f   : > { %v4128_v27 = vpop.permute.xlu1 %4127 }
 0x680   : > { %v4130_v30 = vunpack.i.h.bf16 %v4128_v27  ;;  %v4129_v31 = vunpack.i.l.bf16 %v4128_v27 }
 0x682   : > { %v1292_v34 = vsel %vm1290_vm4, %v1289_v32, %v4130_v30  ;;  %v1291_v35 = vsel %vm1290_vm4, %v1288_v33, %v4129_v31  ;;  %vm3694_vm4 = vmneg %vm1479_vm15 }
 0x683   : > { %v1293_v36 = vpack.c.bf16 %v1292_v34, %v1291_v35 }
 0x685   : > { %3967 = vmatmul.mubr.bf16.vlgmr.msra.gmra.mrb[12].mxu0 %v1293_v36 }
 0x686   : > { %1725 = vmatpush1.bf16.msra.mxu0 %v4163_v47 }
 0x687   : > { %1726 = vmatprep.subr.bf16.mxu0 %v4544_v48 }
 0x68a   : > { %1727 = vmatpush1.bf16.msra.mxu0 %v4165_v50 }
 0x68b   : > { %1728 = vmatprep.subr.bf16.mxu0 %v4544_v48 }
 0x68e   : > { %1729 = vmatpush1.bf16.msra.mxu0 %v4167_v52  ;;  %v4190_v52 = vld [vmem:[%s5612_s2 + $0xe0] sm:$0xff]  }
 0x68f   : > { %1730 = vmatprep.subr.bf16.mxu0 %v4544_v48 }
 0x692   : > { %1731 = vmatpush1.bf16.msra.mxu0 %v4169_v54  ;;  %v4192_v54 = vld [vmem:[%s5612_s2 + $0xf0] sm:$0xff]  }
 0x693   : > { %1732 = vmatprep.subr.bf16.mxu0 %v4544_v48 }
 0x696   : > { %1733 = vmatpush1.bf16.msra.mxu0 %v4171_v56  ;;  %v4194_v56 = vld [vmem:[%s5612_s2 + $0x100] sm:$0xff]  }
 0x697   : > { %1734 = vmatprep.subr.bf16.mxu0 %v4544_v48 }
 0x69a   : > { %1735 = vmatpush1.bf16.msra.mxu0 %v4173_v58  ;;  %v4196_v58 = vld [vmem:[%s5612_s2 + $0x110] sm:$0xff]  }
 0x69b   : > { %1736 = vmatprep.subr.bf16.mxu0 %v4544_v48 }
 0x69e   : > { %1737 = vmatpush1.bf16.msra.mxu0 %v4175_v60 }
 0x69f   : > { %1738 = vmatprep.subr.bf16.mxu0 %v4544_v48 }
 0x6a2   : > { %1739 = vmatpush1.bf16.msra.mxu0 %v4177_v62 }
 0x6a3   : > { %1740 = vmatprep.subr.bf16.mxu0 %v4544_v48 }
 0x6a6   : > { %1741 = vmatpush1.bf16.msra.mxu0 %v4179_v1 }
 0x6a7   : > { %1742 = vmatprep.subr.bf16.mxu0 %v4544_v48 }
 0x6aa   : > { %1743 = vmatpush1.bf16.msra.mxu0 %v4181_v3 }
 0x6ab   : > { %1744 = vmatprep.subr.bf16.mxu0 %v4544_v48 }
 0x6ae   : > { %1745 = vmatpush1.bf16.msra.mxu0 %v4183_v5 }
 0x6af   : > { %1746 = vmatprep.subr.bf16.mxu0 %v4544_v48 }
 0x6b2   : > { %1747 = vmatpush1.bf16.msra.mxu0 %v4185_v12  ;;  %v5231_v12 = vsub.s32 1, %v5029_v39 }
 0x758   : > { %v1392_v16 = vpop.f32.mrb[12].mxu0 }
 0x759   : > { %v1403_v17 = vmul.f32 %v1402_v15, %v1392_v16  ;;  %v3968_v38 = vpop.f32.mrb[13].mxu0 }
 0x75a   : > { %v1395_v18 = vpop.f32.mrb[14].mxu0 }
 0x75b   : > { %v1404_v19 = vmul.f32 %v1402_v15, %v1395_v18  ;;  %v3969_v20 = vpop.f32.mrb[15].mxu0 }
 0x75c   : > { %v5235_v20 = vsub.s32 2, %v5029_v39 }
 0x75d   : > { %v1405_v21 = vpack.c.bf16 %v1404_v19, %v1403_v17  ;;  %v1930_v19 = vrot.slane %v1914_v9, %v5231_v12 }
 0x75f   : > { %v1448_v24 = vshrl.u32 %v1405_v21, 16  ;;  %v1451_v25 = vshll.u32 %v1405_v21, 16  ;;  %1469 = vrot.lane.b32.xlu1 %v1405_v21, %s4542_s26 }
 0x761   : > { %v1450_v26 = vrot.slane %v1448_v24, 7  ;;  %v1460_v27 = vrot.slane %v1451_v25, 1 }
 0x763   : > { %v1453_v31 = vor.u32 %v1451_v25, %v1450_v26  ;;  %v1461_v32 = vor.u32 %v1460_v27, %v1448_v24  ;;  %v1936_v26 = vrot.slane %v1914_v9, %v5235_v20  ;;  %v5287_v9 = vadd.s32 24, %v5029_v39 }
 0x765   : > { %v1466_v33 = vsel %vm5158_vm13, %v1461_v32, 0  ;;  %v1458_v34 = vsel %vm5163_vm14, 0, %v1453_v31 }
 0x766   : > { %v1467_v35 = vmul.bf16 %v1466_v33, %v1446_v29  ;;  %v1459_v36 = vmul.bf16 %v1458_v34, %v1439_v45  ;;  %v4188_v45 = vld [vmem:[%s5612_s2 + $0xd0] sm:$0xff]   ;;  %v4199_v34 = vld [vmem:[#allocation4 + $0x8] sm:$0xff]  }
 0x768   : > { %3680 = vmatprep.mubr.msk.bf16.mxu1 %vm961_vm2, %v1467_v35  ;;  %v1478_v37 = vrot.slane %v1467_v35, 6  ;;  %v1766_v42 = vrot.slane %v1467_v35, 2  ;;  %v4200_v35 = vld [vmem:[#allocation4 + $0x10] sm:$0xff]  }
 0x76a   : > { %v1485_v41 = vsel %vm1479_vm15, 0, %v1478_v37  ;;  %v1772_v43 = vsel %vm1767_vm0, %v1766_v42, 0  ;;  %v2059_v37 = vand.u32 7, %v5029_v39 }
 0x76b   : > { %3693 = vmatprep.mubr.msk.bf16.mxu0 %vm961_vm2, %v1485_v41  ;;  %v2066_v41 = vand.u32 7, %v5032_v40 }
 0x76c   : > { %vm2151_vm7 = vcmp.ne.s32.totalorder %v2059_v37, 0  ;;  %vm2179_vm9 = vcmp.ne.s32.totalorder %v2059_v37, 7 }
 0x76d   : > { %vm2152_vm8 = vcmp.ne.s32.totalorder %v2066_v41, 0  ;;  %v5249_v42 = vsel %vm2151_vm7, 1.0, %v4539_v0  ;;  %vm2180_vm11 = vcmp.ne.s32.totalorder %v2066_v41, 7 }
 0x76e   : > { %v3727_v40 = vsel %vm2180_vm11, 1.0, %v4539_v0 }
 0x7d1   : > { %v1470_v47 = vpop.permute.xlu1 %1469 }
 0x7d2   : > { %v1473_v49 = vsel %vm961_vm2, %v1459_v36, %v1470_v47  ;;  %v4201_v36 = vld [vmem:[#allocation4 + $0x18] sm:$0xff]  }
 0x7d3   : > { %v1477_v50 = vrot.slane %v1473_v49, 6  ;;  %1642 = vmatmul.mubr.bf16.vlgmr.msra.gmra.mrb[20].mxu1 %v1473_v49  ;;  %v1765_v60 = vrot.slane %v1473_v49, 2  ;;  %v4202_v49 = vld [vmem:[#allocation7 + $0x60] sm:$0xff]  }
 0x7d4   : > { %1872 = vmatpush1.bf16.msra.mxu1 %v4186_v46  ;;  %3708 = vmatprep.mubr.msk.bf16.mxu1 %vm961_vm2, %v1772_v43  ;;  %v5252_v46 = vsel %vm2152_vm8, 1.0, %v4539_v0  ;;  %v4204_v43 = vld [vmem:[#allocation7 + $0x68] sm:$0xff]  }
 0x7d5   : > { %3695 = vmatmul.mubr.msk.bf16.vlgmr.msra.gmra.mrb[16].mxu0 %vm3694_vm4, %v1477_v50  ;;  %1873 = vmatprep.subr.bf16.mxu1 %v4544_v48  ;;  %v2175_v47 = vpack.c.bf16 %v5252_v46, %v5249_v42  ;;  %v4203_v50 = vld [vmem:[#allocation7] sm:$0xff]   ;;  %vm2303_vm4 = vcmask 1043456  }
 0x7d6   : > { %3972 = vmatprep.mubr.msk.bf16.mxu0 %vm712_vm1, %v4198_v61  ;;  %v4217_v61 = vld [vmem:[#allocation7 + $0x38] sm:$0xff]  }
 0x7d8   : > { %1874 = vmatpush1.bf16.msra.mxu1 %v4187_v44  ;;  %v4205_v44 = vld [vmem:[#allocation7 + $0x8] sm:$0xff]  }
 0x7d9   : > { %1875 = vmatprep.subr.bf16.mxu1 %v4544_v48 }
 0x7dc   : > { %1876 = vmatpush1.bf16.msra.mxu1 %v4188_v45  ;;  %v4206_v45 = vld [vmem:[#allocation7 + $0x70] sm:$0xff]  }
 0x7dd   : > { %1877 = vmatprep.subr.bf16.mxu1 %v4544_v48 }
 0x7e0   : > { %1878 = vmatpush1.bf16.msra.mxu1 %v4189_v51  ;;  %v4207_v51 = vld [vmem:[#allocation7 + $0x10] sm:$0xff]  }
 0x7e1   : > { %1879 = vmatprep.subr.bf16.mxu1 %v4544_v48 }
 0x7e4   : > { %1880 = vmatpush1.bf16.msra.mxu1 %v4190_v52  ;;  %v4208_v52 = vld [vmem:[#allocation7 + $0x78] sm:$0xff]  }
 0x7e5   : > { %1881 = vmatprep.subr.bf16.mxu1 %v4544_v48 }
 0x7e8   : > { %1882 = vmatpush1.bf16.msra.mxu1 %v4191_v53  ;;  %v4209_v53 = vld [vmem:[#allocation7 + $0x18] sm:$0xff]  }
 0x7e9   : > { %1883 = vmatprep.subr.bf16.mxu1 %v4544_v48 }
 0x7ec   : > { %1884 = vmatpush1.bf16.msra.mxu1 %v4192_v54  ;;  %v4210_v54 = vld [vmem:[#allocation7 + $0x80] sm:$0xff]  }
 0x7ed   : > { %1885 = vmatprep.subr.bf16.mxu1 %v4544_v48 }
 0x7f0   : > { %1886 = vmatpush1.bf16.msra.mxu1 %v4193_v55  ;;  %v4211_v55 = vld [vmem:[#allocation7 + $0x20] sm:$0xff]  }
 0x7f1   : > { %1887 = vmatprep.subr.bf16.mxu1 %v4544_v48 }
 0x7f4   : > { %1888 = vmatpush1.bf16.msra.mxu1 %v4194_v56  ;;  %v4212_v56 = vld [vmem:[#allocation7 + $0x88] sm:$0xff]  }
 0x7f5   : > { %1889 = vmatprep.subr.bf16.mxu1 %v4544_v48 }
 0x7f8   : > { %1890 = vmatpush1.bf16.msra.mxu1 %v4195_v57  ;;  %v4213_v57 = vld [vmem:[#allocation7 + $0x28] sm:$0xff]  }
 0x7f9   : > { %1891 = vmatprep.subr.bf16.mxu1 %v4544_v48 }
 0x7fc   : > { %1892 = vmatpush1.bf16.msra.mxu1 %v4196_v58  ;;  %v4214_v58 = vld [vmem:[#allocation7 + $0x90] sm:$0xff]  }
 0x7fd   : > { %1893 = vmatprep.subr.bf16.mxu1 %v4544_v48 }
 0x800   : > { %1894 = vmatpush1.bf16.msra.mxu1 %v4197_v59  ;;  %v4215_v59 = vld [vmem:[#allocation7 + $0x30] sm:$0xff]  }
 0x801   : > { %2607 = vmatprep.subr.bf16.mxu1 %v4544_v48 }
 0x803   : > { %3709 = vmatmul.mubr.msk.bf16.vlgmr.msra.gmra.mrb[24].mxu1 %vm1767_vm0, %v1765_v60  ;;  %v4216_v60 = vld [vmem:[#allocation7 + $0x98] sm:$0xff]  }
 0x804   : > { %2608 = vmatpush1.bf16.msra.mxu1 %v4203_v50 }
 0x805   : > { %2609 = vmatprep.subr.bf16.mxu1 %v4544_v48 }
 0x808   : > { %2610 = vmatpush1.bf16.msra.mxu1 %v4205_v44 }
 0x809   : > { %2611 = vmatprep.subr.bf16.mxu1 %v4544_v48 }
 0x80c   : > { %2612 = vmatpush1.bf16.msra.mxu1 %v4207_v51 }
 0x80d   : > { %2613 = vmatprep.subr.bf16.mxu1 %v4544_v48 }
 0x810   : > { %2614 = vmatpush1.bf16.msra.mxu1 %v4209_v53 }
 0x811   : > { %2615 = vmatprep.subr.bf16.mxu1 %v4544_v48 }
 0x814   : > { %2616 = vmatpush1.bf16.msra.mxu1 %v4211_v55 }
 0x815   : > { %2617 = vmatprep.subr.bf16.mxu1 %v4544_v48 }
 0x818   : > { %2618 = vmatpush1.bf16.msra.mxu1 %v4213_v57 }
 0x819   : > { %2619 = vmatprep.subr.bf16.mxu1 %v4544_v48 }
 0x81c   : > { %2620 = vmatpush1.bf16.msra.mxu1 %v4215_v59 }
 0x81d   : > { %2621 = vmatprep.subr.bf16.mxu1 %v4544_v48 }
 0x820   : > { %2622 = vmatpush1.bf16.msra.mxu1 %v4217_v61 }
 0x821   : > { %2623 = vmatprep.subr.bf16.mxu1 %v4544_v48 }
 0x8a6   : > { %v1643_v62 = vpop.f32.mrb[20].mxu1 }
 0x8a7   : > { %v1645_v63 = vpop.f32.mrb[21].mxu1 }
 0x8a8   : > { %v1646_v1 = vpop.f32.mrb[22].mxu1  ;;  %v1758_v2 = vpop.f32.mrb[16].mxu0  ;;  %v4219_v63 = vld [vmem:[#allocation7 + $0x40] sm:$0xff]  }
 0x8a9   : > { %v1759_v3 = vadd.f32 %v1758_v2, %v1643_v62  ;;  %v1648_v4 = vpop.f32.mrb[23].mxu1  ;;  %v1760_v5 = vpop.f32.mrb[17].mxu0  ;;  %v4218_v62 = vld [vmem:[#allocation7 + $0xa0] sm:$0xff]   ;;  %2624 = vmatpush1.bf16.msra.mxu1 %v4219_v63  ;;  %v4221_v2 = vld [vmem:[#allocation7 + $0x48] sm:$0xff]  }
 0x8aa   : > { %v1761_v6 = vpop.f32.mrb[18].mxu0  ;;  %2625 = vmatprep.subr.bf16.mxu1 %v4544_v48  ;;  %v4223_v4 = vld [vmem:[#allocation7 + $0x50] sm:$0xff]   ;;  %v4224_v5 = vld [vmem:[#allocation7 + $0xb8] sm:$0xff]  }
 0x8ab   : > { %v1762_v7 = vadd.f32 %v1761_v6, %v1646_v1  ;;  %v1763_v8 = vpop.f32.mrb[19].mxu0  ;;  %v4220_v1 = vld [vmem:[#allocation7 + $0xa8] sm:$0xff]   ;;  %v4225_v6 = vld [vmem:[#allocation7 + $0x58] sm:$0xff]  }
 0x8ac   : > { %v5284_v8 = vadd.s32 16, %v5029_v39 }
 0x8ad   : > { %2626 = vmatpush1.bf16.msra.mxu1 %v4221_v2 }
 0x8ae   : > { %2627 = vmatprep.subr.bf16.mxu1 %v4544_v48 }
 0x8b1   : > { %2628 = vmatpush1.bf16.msra.mxu1 %v4223_v4 }
 0x8b2   : > { %2629 = vmatprep.subr.bf16.mxu1 %v4544_v48 }
 0x8b5   : > { %2630 = vmatpush1.bf16.msra.mxu1 %v4225_v6 }
 0x8d6   : > { %v1905_v11 = vpop.f32.mrb[24].mxu1 }
 0x8d7   : > { %v1912_v13 = vadd.f32 %v1905_v11, %v1759_v3  ;;  %v1907_v15 = vpop.f32.mrb[25].mxu1  ;;  %v4222_v3 = vld [vmem:[#allocation7 + $0xb0] sm:$0xff]  }
 0x8d8   : > { %v1908_v16 = vpop.f32.mrb[26].mxu1 }
 0x8d9   : > { %v1919_v17 = vadd.f32 %v1918_v10, %v1912_v13  ;;  %v1913_v38 = vadd.f32 %v1908_v16, %v1762_v7  ;;  %v1910_v18 = vpop.f32.mrb[27].mxu1  ;;  %v5293_v13 = vadd.s32 56, %v5029_v39  ;;  %v3726_v16 = vsel %vm2179_vm9, 1.0, %v4539_v0 }
 0x8db   : > { %vm1921_vm5 = vcmp.ge.f32.partialorder %v1919_v17, 0.0  ;;  %v1923_v21 = vmul.f32 0.02, %v1919_v17  ;;  %v1920_v22 = vadd.f32 %v1918_v10, %v1913_v38  ;;  %v5290_v10 = vadd.s32 48, %v5029_v39 }
 0x8dd   : > { %v1925_v23 = vsel %vm1921_vm5, %v1919_v17, %v1923_v21  ;;  %vm1922_vm6 = vcmp.ge.f32.partialorder %v1920_v22, 0.0  ;;  %v1924_v24 = vmul.f32 0.02, %v1920_v22  ;;  %v5298_v17 = vadd.s32 32, %v5029_v39 }
 0x8de   : > { %v1931_v25 = vmul.f32 %v1930_v19, %v1925_v23  ;;  %v2080_v23 = vand.u32 7, %v5287_v9 }
 0x8df   : > { %v1926_v27 = vsel %vm1922_vm6, %v1920_v22, %v1924_v24  ;;  %v2073_v22 = vand.u32 7, %v5284_v8  ;;  %v2101_v24 = vand.u32 7, %v5290_v10 }
 0x8e0   : > { %v1932_v29 = vmul.f32 %v1930_v19, %v1926_v27  ;;  %v1937_v31 = vadd.f32 %v1936_v26, %v1931_v25  ;;  %v5301_v19 = vadd.s32 40, %v5029_v39  ;;  %v2203_v27 = vpack.c.bf16 %v3727_v40, %v3726_v16 }
 0x8e1   : > { %vm2181_vm15 = vcmp.ne.s32.totalorder %v2073_v22, 7  ;;  %v2087_v39 = vand.u32 7, %v5298_v17  ;;  %vm2182_vm0 = vcmp.ne.s32.totalorder %v2080_v23, 7  ;;  %vm2185_vm5 = vcmp.ne.s32.totalorder %v2101_v24, 7 }
 0x8e2   : > { %v1938_v32 = vadd.f32 %v1936_v26, %v1932_v29  ;;  %v2108_v29 = vand.u32 7, %v5293_v13  ;;  %v3728_v44 = vsel %vm2181_vm15, 1.0, %v4539_v0  ;;  %v3729_v53 = vsel %vm2182_vm0, 1.0, %v4539_v0  ;;  %vm3763_vm15 = vmneg %vm2303_vm4 }
 0x8e3   : > { %vm5323_vm7 = vcmp.ne.s32.totalorder %v2087_v39, 7  ;;  %v2204_v16 = vpack.c.bf16 %v3729_v53, %v3728_v44  ;;  %vm2155_vm9 = vcmp.ne.s32.totalorder %v2087_v39, 0 }
 0x8e4   : > { %v1947_v33 = vpack.c.bf16 %v1938_v32, %v1937_v31  ;;  %vm2186_vm6 = vcmp.ne.s32.totalorder %v2108_v29, 7  ;;  %v3730_v30 = vsel %vm5323_vm7, 1.0, %v4539_v0 }
 0x8e6   : > { %3970 = vmatprep.subr.bf16.mxu0 %v1947_v33 }
 0x8e7   : > { %3971 = vmatpush3.bf16.msra.mxu0 %v1947_v33 }
 0x8e8   : > { %2459 = vmatprep.subr.bf16.mxu0 %v4544_v48 }
 0x8ea   : > { %3973 = vmatmul.mubr.msk.bf16.vlgmr.msra.gmra.mrb[20].mxu0 %vm712_vm1, %v4199_v34 }
 0x8eb   : > { %3976 = vmatprep.mubr.msk.bf16.mxu0 %vm712_vm1, %v4200_v35  ;;  %2460 = vmatpush1.bf16.msra.mxu0 %v4202_v49  ;;  %v2094_v35 = vand.u32 7, %v5301_v19 }
 0x8ec   : > { %2461 = vmatprep.subr.bf16.mxu0 %v4544_v48 }
 0x8ed   : > { %vm2184_vm8 = vcmp.ne.s32.totalorder %v2094_v35, 7  ;;  %vm2156_vm11 = vcmp.ne.s32.totalorder %v2094_v35, 0  ;;  %v4227_v35 = vld [vmem:[#allocation7 + $0xc8] sm:$0xff]  }
 0x8ee   : > { %v3731_v6 = vsel %vm2184_vm8, 1.0, %v4539_v0  ;;  %v3723_v13 = vsel %vm2156_vm11, 1.0, %v4539_v0 }
 0x8ef   : > { %2462 = vmatpush1.bf16.msra.mxu0 %v4204_v43 }
 0x8f0   : > { %2463 = vmatprep.subr.bf16.mxu0 %v4544_v48 }
 0x8f2   : > { %3977 = vmatmul.mubr.msk.bf16.gmra.mrb[24].mxu0 %vm712_vm1, %v4201_v36 }
 0x8f3   : > { %2464 = vmatpush1.bf16.msra.mxu0 %v4206_v45 }
 0x8f4   : > { %2465 = vmatprep.subr.bf16.mxu0 %v4544_v48 }
 0x8f7   : > { %2466 = vmatpush1.bf16.msra.mxu0 %v4208_v52 }
 0x8f8   : > { %2467 = vmatprep.subr.bf16.mxu0 %v4544_v48 }
 0x8fb   : > { %2468 = vmatpush1.bf16.msra.mxu0 %v4210_v54 }
 0x8fc   : > { %2469 = vmatprep.subr.bf16.mxu0 %v4544_v48 }
 0x8ff   : > { %2470 = vmatpush1.bf16.msra.mxu0 %v4212_v56 }
 0x900   : > { %2471 = vmatprep.subr.bf16.mxu0 %v4544_v48 }
 0x903   : > { %2472 = vmatpush1.bf16.msra.mxu0 %v4214_v58  ;;  %v3732_v58 = vsel %vm2185_vm5, 1.0, %v4539_v0 }
 0x904   : > { %2473 = vmatprep.subr.bf16.mxu0 %v4544_v48 }
 0x907   : > { %2474 = vmatpush1.bf16.msra.mxu0 %v4216_v60 }
 0x908   : > { %2475 = vmatprep.subr.bf16.mxu0 %v4544_v48 }
 0x90b   : > { %2476 = vmatpush1.bf16.msra.mxu0 %v4218_v62  ;;  %v3733_v62 = vsel %vm2186_vm6, 1.0, %v4539_v0 }
 0x90c   : > { %2477 = vmatprep.subr.bf16.mxu0 %v4544_v48  ;;  %v2206_v42 = vpack.c.bf16 %v3733_v62, %v3732_v58 }
 0x90f   : > { %2478 = vmatpush1.bf16.msra.mxu0 %v4220_v1 }
 0x910   : > { %2479 = vmatprep.subr.bf16.mxu0 %v4544_v48 }
 0x913   : > { %2480 = vmatpush1.bf16.msra.mxu0 %v4222_v3 }
 0x914   : > { %2481 = vmatprep.subr.bf16.mxu0 %v4544_v48 }
 0x917   : > { %2482 = vmatpush1.bf16.msra.mxu0 %v4224_v5 }
 0x918   : > { %2775 = vmatprep.subr.bf16.mxu0 %v4544_v48 }
 0x9bd   : > { %v3974_v7 = vpop.f32.mrb[20].mxu0 }
 0x9be   : > { %v2014_v11 = vpop.f32.mrb[21].mxu0 }
 0x9bf   : > { %v3975_v15 = vpop.f32.mrb[22].mxu0 }
 0x9c0   : > { %v2046_v38 = vpack.c.bf16 %v3975_v15, %v3974_v7  ;;  %v2017_v18 = vpop.f32.mrb[23].mxu0 }
 0x9c1   : > { %v2045_v21 = vpack.c.bf16 %v2017_v18, %v2014_v11 }
 0x9c2   : > { %v2215_v25 = vshrl.u32 %v2046_v38, 16  ;;  %v2218_v26 = vshll.u32 %v2046_v38, 16  ;;  %2273 = vrot.lane.b32.xlu1 %v2046_v38, %s4542_s26 }
 0x9c3   : > { %v2208_v31 = vshrl.u32 %v2045_v21, 16  ;;  %v2211_v32 = vshll.u32 %v2045_v21, 16  ;;  %2271 = vrot.lane.b32.xlu0 %v2045_v21, %s4542_s26  ;;  %v2205_v21 = vpack.c.bf16 %v3731_v6, %v3730_v30  ;;  %v4230_v30 = vld [vmem:[#allocation7 + $0xe0] sm:$0xff]   ;;  %v4231_v6 = vld [vmem:[#allocation7 + $0xe8] sm:$0xff]  }
 0x9c4   : > { %v2217_v33 = vrot.slane %v2215_v25, 7  ;;  %v2249_v34 = vrot.slane %v2218_v26, 1 }
 0x9c5   : > { %v2210_v36 = vrot.slane %v2208_v31, 7  ;;  %v2247_v37 = vrot.slane %v2211_v32, 1  ;;  %v3978_v41 = vpop.f32.mrb[24].mxu0 }
 0x9c6   : > { %v2220_v49 = vor.u32 %v2218_v26, %v2217_v33  ;;  %v2251_v50 = vor.u32 %v2249_v34, %v2215_v25  ;;  %v2030_v43 = vpop.f32.mrb[25].mxu0 }
 0x9c7   : > { %v2213_v45 = vor.u32 %v2211_v32, %v2210_v36  ;;  %v2248_v51 = vor.u32 %v2247_v37, %v2208_v31  ;;  %v3979_v52 = vpop.f32.mrb[26].mxu0 }
 0x9c8   : > { %v2048_v55 = vpack.c.bf16 %v3979_v52, %v3978_v41  ;;  %v2033_v56 = vpop.f32.mrb[27].mxu0  ;;  %v2221_v57 = vsel %vm1456_vm12, %v2210_v36, %v2220_v49 }
 0x9c9   : > { %v2047_v59 = vpack.c.bf16 %v2033_v56, %v2030_v43  ;;  %v2250_v60 = vsel %vm1464_vm10, %v2248_v51, %v2249_v34  ;;  %v2242_v61 = vsel %vm5163_vm14, 0, %v2213_v45  ;;  %vm2158_vm14 = vcmp.ne.s32.totalorder %v2108_v29, 0 }
 0x9ca   : > { %v2231_v63 = vshrl.u32 %v2048_v55, 16  ;;  %v2234_v1 = vshll.u32 %v2048_v55, 16  ;;  %2277 = vrot.lane.b32.xlu1 %v2048_v55, %s4542_s26  ;;  %v2263_v2 = vmul.bf16 %v2250_v60, %v2203_v27  ;;  %v2243_v3 = vmul.bf16 %v2242_v61, %v2175_v47 }
 0x9cb   : > { %v2223_v4 = vshrl.u32 %v2047_v59, 16  ;;  %v2226_v5 = vshll.u32 %v2047_v59, 16  ;;  %2275 = vrot.lane.b32.xlu0 %v2047_v59, %s4542_s26  ;;  %v3725_v54 = vsel %vm2158_vm14, 1.0, %v4539_v0  ;;  %v4228_v59 = vld [vmem:[#allocation7 + $0xd0] sm:$0xff]  }
 0x9cc   : > { %v2233_v7 = vrot.slane %v2231_v63, 7  ;;  %v2255_v11 = vrot.slane %v2234_v1, 1  ;;  %3746 = vmatprep.mubr.msk.bf16.mxu0 %vm961_vm2, %v2263_v2  ;;  %v2305_v15 = vrot.slane %v2263_v2, 4 }
 0x9cd   : > { %v2225_v40 = vrot.slane %v2223_v4, 7  ;;  %v2252_v38 = vrot.slane %v2226_v5, 1 }
 0x9ce   : > { %v2236_v46 = vor.u32 %v2234_v1, %v2233_v7  ;;  %v2257_v47 = vor.u32 %v2255_v11, %v2231_v63  ;;  %v2326_v18 = vsel %vm2303_vm4, 0, %v2305_v15  ;;  %v4232_v7 = vld [vmem:[#allocation7 + $0xf0] sm:$0xff]  }
 0x9cf   : > { %v2228_v25 = vor.u32 %v2226_v5, %v2225_v40  ;;  %v2254_v26 = vor.u32 %v2252_v38, %v2223_v4  ;;  %3762 = vmatprep.mubr.msk.bf16.mxu1 %vm961_vm2, %v2326_v18  ;;  %v2253_v27 = vsel %vm1464_vm10, %v2251_v50, %v2252_v38  ;;  %v4237_v38 = vld [vmem:[#allocation7 + $0x118] sm:$0xff]  }
 0x9d0   : > { %v2264_v31 = vmul.bf16 %v2253_v27, %v2204_v16  ;;  %v2262_v32 = vsel %vm5158_vm13, %v2257_v47, 0  ;;  %v2237_v34 = vsel %vm1456_vm12, %v2225_v40, %v2236_v46  ;;  %vm2157_vm13 = vcmp.ne.s32.totalorder %v2101_v24, 0  ;;  %v4235_v16 = vld [vmem:[#allocation7 + $0x108] sm:$0xff]   ;;  %v4236_v40 = vld [vmem:[#allocation7 + $0x110] sm:$0xff]  }
 0x9d1   : > { %v2256_v36 = vsel %vm1464_vm10, %v2254_v26, %v2255_v11  ;;  %v2229_v37 = vsel %vm1456_vm12, %v2217_v33, %v2228_v25  ;;  %v5353_v41 = vmul.bf16 %v2262_v32, %v2206_v42  ;;  %vm2153_vm10 = vcmp.ne.s32.totalorder %v2073_v22, 0  ;;  %v4226_v22 = vld [vmem:[#allocation7 + $0xc0] sm:$0xff]   ;;  %v4233_v11 = vld [vmem:[#allocation7 + $0xf8] sm:$0xff]  }
 0x9d2   : > { %v2308_v49 = vrot.slane %v2264_v31, 4  ;;  %v2265_v43 = vmul.bf16 %v2256_v36, %v2205_v21  ;;  %vm2154_vm12 = vcmp.ne.s32.totalorder %v2080_v23, 0  ;;  %v3720_v33 = vsel %vm2153_vm10, 1.0, %v4539_v0  ;;  %v4239_v46 = vld [vmem:[%s5619_s30 + $0x8] sm:$0xff]  }
 0x9d3   : > { %v2316_v44 = vrot.slane %v5353_v41, 4  ;;  %v3721_v52 = vsel %vm2154_vm12, 1.0, %v4539_v0  ;;  %v3724_v23 = vsel %vm2157_vm13, 1.0, %v4539_v0  ;;  %v3722_v24 = vsel %vm2155_vm9, 1.0, %v4539_v0 }
 0x9d4   : > { %v5357_v45 = vsel %vm2303_vm4, %v2305_v15, %v2308_v49  ;;  %v2312_v50 = vrot.slane %v2265_v43, 4  ;;  %v2176_v53 = vpack.c.bf16 %v3721_v52, %v3720_v33  ;;  %v2178_v39 = vpack.c.bf16 %v3725_v54, %v3724_v23  ;;  %v4234_v15 = vld [vmem:[#allocation7 + $0x100] sm:$0xff]  }
 0x9d5   : > { %v2177_v56 = vpack.c.bf16 %v3723_v13, %v3722_v24  ;;  %v2676_v42 = vsel %vm2303_vm4, %v2316_v44, 0  ;;  %vm3163_vm9 = vcmask 31744  }
 0x9d6   : > { %v5360_v51 = vsel %vm2303_vm4, %v2308_v49, %v2312_v50  ;;  %v5365_v28 = vsel %vm2303_vm4, %v2312_v50, %v2316_v44  ;;  %v2244_v8 = vmul.bf16 %v2221_v57, %v2176_v53  ;;  %v2246_v0 = vmul.bf16 %v2237_v34, %v2178_v39 }
 0x9d7   : > { %v2245_v60 = vmul.bf16 %v2229_v37, %v2177_v56 }
 0xa34   : > { %v2274_v9 = vpop.permute.xlu1 %2273 }
 0xa35   : > { %v2272_v55 = vpop.permute.xlu0 %2271  ;;  %v2285_v10 = vsel %vm961_vm2, %v2244_v8, %v2274_v9 }
 0xa36   : > { %v2281_v17 = vsel %vm961_vm2, %v2243_v3, %v2272_v55  ;;  %v2306_v19 = vrot.slane %v2285_v10, 4  ;;  %v4229_v3 = vld [vmem:[#allocation7 + $0xd8] sm:$0xff]  }
 0xa37   : > { %v2304_v29 = vrot.slane %v2281_v17, 4  ;;  %2492 = vmatmul.mubr.bf16.vlgmr.msra.gmra.mrb[28].mxu0 %v2281_v17 }
 0xa38   : > { %2776 = vmatpush1.bf16.msra.mxu0 %v4226_v22  ;;  %3747 = vmatprep.mubr.msk.bf16.mxu0 %vm961_vm2, %v2264_v31 }
 0xa39   : > { %3764 = vmatmul.mubr.msk.bf16.vlgmr.msra.gmra.mrb[28].mxu1 %vm3763_vm15, %v2304_v29  ;;  %2777 = vmatprep.subr.bf16.mxu0 %v4544_v48  ;;  %v2307_v57 = vsel %vm2303_vm4, %v2304_v29, %v2306_v19 }
 0xa3a   : > { %3765 = vmatprep.mubr.msk.bf16.mxu1 %vm961_vm2, %v5357_v45 }
 0xa3c   : > { %2778 = vmatpush1.bf16.msra.mxu0 %v4227_v35  ;;  %v2278_v58 = vpop.permute.xlu1 %2277 }
 0xa3d   : > { %v2276_v61 = vpop.permute.xlu0 %2275  ;;  %2779 = vmatprep.subr.bf16.mxu0 %v4544_v48  ;;  %v2293_v62 = vsel %vm961_vm2, %v2246_v0, %v2278_v58 }
 0xa3e   : > { %v2289_v63 = vsel %vm961_vm2, %v2245_v60, %v2276_v61  ;;  %v2314_v1 = vrot.slane %v2293_v62, 4 }
 0xa3f   : > { %2500 = vmatmul.mubr.bf16.gmra.mrb[32].mxu0 %v2285_v10  ;;  %v2310_v2 = vrot.slane %v2289_v63, 4 }
 0xa40   : > { %2780 = vmatpush1.bf16.msra.mxu0 %v4228_v59  ;;  %3748 = vmatprep.mubr.msk.bf16.mxu0 %vm961_vm2, %v2265_v43  ;;  %v2848_v59 = vld [vmem:[#allocation9] sm:$0x7] }
 0xa41   : > { %2648 = vmatmul.mubr.bf16.gmra.mrb[32].mxu1 %v2307_v57  ;;  %2781 = vmatprep.subr.bf16.mxu0 %v4544_v48  ;;  %v2311_v4 = vsel %vm2303_vm4, %v2306_v19, %v2310_v2  ;;  %v2315_v5 = vsel %vm2303_vm4, %v2310_v2, %v2314_v1  ;;  %v5436_v60 = vrot.slane %v2848_v59, %v5147_v14 }
 0xa42   : > { %3766 = vmatprep.mubr.msk.bf16.mxu1 %vm961_vm2, %v5360_v51 }
 0xa44   : > { %2782 = vmatpush1.bf16.msra.mxu0 %v4229_v3 }
 0xa45   : > { %2783 = vmatprep.subr.bf16.mxu0 %v4544_v48 }
 0xa47   : > { %2508 = vmatmul.mubr.bf16.gmra.mrb[36].mxu0 %v2289_v63 }
 0xa48   : > { %2784 = vmatpush1.bf16.msra.mxu0 %v4230_v30  ;;  %3749 = vmatprep.mubr.msk.bf16.mxu0 %vm961_vm2, %v5353_v41 }
 0xa49   : > { %2656 = vmatmul.mubr.bf16.gmra.mrb[36].mxu1 %v2311_v4  ;;  %2785 = vmatprep.subr.bf16.mxu0 %v4544_v48 }
 0xa4a   : > { %3767 = vmatprep.mubr.msk.bf16.mxu1 %vm961_vm2, %v5365_v28 }
 0xa4c   : > { %2786 = vmatpush1.bf16.msra.mxu0 %v4231_v6 }
 0xa4d   : > { %2787 = vmatprep.subr.bf16.mxu0 %v4544_v48 }
 0xa4f   : > { %2516 = vmatmul.mubr.bf16.gmra.mrb[40].mxu0 %v2293_v62 }
 0xa50   : > { %2788 = vmatpush1.bf16.msra.mxu0 %v4232_v7  ;;  %3780 = vmatprep.mubr.msk.bf16.mxu0 %vm961_vm2, %v5357_v45  ;;  %v5444_v7 = vrot.slane %v2848_v59, %v5235_v20 }
 0xa51   : > { %2664 = vmatmul.mubr.bf16.gmra.mrb[40].mxu1 %v2315_v5  ;;  %2789 = vmatprep.subr.bf16.mxu0 %v4544_v48 }
 0xa54   : > { %2790 = vmatpush1.bf16.msra.mxu0 %v4233_v11 }
 0xa55   : > { %2791 = vmatprep.subr.bf16.mxu0 %v4544_v48 }
 0xa58   : > { %2792 = vmatpush1.bf16.msra.mxu0 %v4234_v15 }
 0xa59   : > { %2793 = vmatprep.subr.bf16.mxu0 %v4544_v48 }
 0xa5c   : > { %2794 = vmatpush1.bf16.msra.mxu0 %v4235_v16 }
 0xa5d   : > { %2795 = vmatprep.subr.bf16.mxu0 %v4544_v48 }
 0xa60   : > { %2796 = vmatpush1.bf16.msra.mxu0 %v4236_v40 }
 0xa61   : > { %2797 = vmatprep.subr.bf16.mxu0 %v4544_v48  ;;  %v4238_v48 = vld [vmem:[%s5619_s30] sm:$0xff]  }
 0xa62   : > { %3980 = vmatprep.subr.bf16.mxu1 %v4238_v48 }
 0xa63   : > { %3981 = vmatpush3.bf16.msra.mxu1 %v4238_v48 }
 0xa64   : > { %2798 = vmatpush1.bf16.msra.mxu0 %v4237_v38  ;;  %3982 = vmatprep.subr.bf16.mxu1 %v4239_v46 }
 0xa67   : > { %2808 = vmatmul.mubr.bf16.vlgmr.msra.gmra.mrb[44].mxu0 %v2307_v57  ;;  %3983 = vmatpush3.bf16.msra.mxu1 %v4239_v46 }
 0xa68   : > { %3781 = vmatprep.mubr.msk.bf16.mxu0 %vm961_vm2, %v5360_v51 }
 0xa6f   : > { %2816 = vmatmul.mubr.bf16.gmra.mrb[48].mxu0 %v2311_v4 }
 0xa70   : > { %3782 = vmatprep.mubr.msk.bf16.mxu0 %vm961_vm2, %v5365_v28 }
 0xa77   : > { %2824 = vmatmul.mubr.bf16.gmra.mrb[52].mxu0 %v2315_v5  ;;  %v5440_v5 = vrot.slane %v2848_v59, %v5231_v12 }
 0xa78   : > { %3783 = vmatprep.mubr.msk.bf16.mxu0 %vm961_vm2, %v2676_v42 }
 0xa7f   : > { %3784 = vmatmul.mubr.msk.bf16.gmra.mrb[56].mxu0 %vm2303_vm4, %v2314_v1 }
 0xb0a   : > { %v2493_v47 = vpop.f32.mrb[28].mxu0 }
 0xb0b   : > { %v2495_v18 = vpop.f32.mrb[29].mxu0 }
 0xb0c   : > { %v2496_v21 = vpop.f32.mrb[30].mxu0  ;;  %v2641_v25 = vpop.f32.mrb[28].mxu1 }
 0xb0d   : > { %v2642_v26 = vadd.f32 %v2641_v25, %v2493_v47  ;;  %v2498_v27 = vpop.f32.mrb[31].mxu0  ;;  %v2643_v31 = vpop.f32.mrb[29].mxu1 }
 0xb0e   : > { %v2644_v32 = vpop.f32.mrb[30].mxu1 }
 0xb0f   : > { %v2645_v34 = vadd.f32 %v2644_v32, %v2496_v21  ;;  %v2646_v36 = vpop.f32.mrb[31].mxu1 }
 0xb12   : > { %v2501_v37 = vpop.f32.mrb[32].mxu0 }
 0xb13   : > { %v2503_v41 = vpop.f32.mrb[33].mxu0 }
 0xb14   : > { %v2504_v49 = vpop.f32.mrb[34].mxu0  ;;  %v2649_v43 = vpop.f32.mrb[32].mxu1 }
 0xb15   : > { %v2650_v44 = vadd.f32 %v2649_v43, %v2501_v37  ;;  %v2506_v45 = vpop.f32.mrb[35].mxu0  ;;  %v2651_v50 = vpop.f32.mrb[33].mxu1 }
 0xb16   : > { %v2652_v51 = vpop.f32.mrb[34].mxu1 }
 0xb17   : > { %v2653_v28 = vadd.f32 %v2652_v51, %v2504_v49  ;;  %v2654_v33 = vpop.f32.mrb[35].mxu1 }
 0xb1a   : > { %v2509_v52 = vpop.f32.mrb[36].mxu0 }
 0xb1b   : > { %v2511_v53 = vpop.f32.mrb[37].mxu0 }
 0xb1c   : > { %v2512_v8 = vpop.f32.mrb[38].mxu0  ;;  %v2657_v9 = vpop.f32.mrb[36].mxu1 }
 0xb1d   : > { %v2658_v22 = vadd.f32 %v2657_v9, %v2509_v52  ;;  %v2514_v23 = vpop.f32.mrb[39].mxu0  ;;  %v2659_v54 = vpop.f32.mrb[37].mxu1 }
 0xb1e   : > { %v2660_v55 = vpop.f32.mrb[38].mxu1 }
 0xb1f   : > { %v2661_v10 = vadd.f32 %v2660_v55, %v2512_v8  ;;  %v2662_v24 = vpop.f32.mrb[39].mxu1 }
 0xb22   : > { %v2517_v13 = vpop.f32.mrb[40].mxu0 }
 0xb23   : > { %v2519_v17 = vpop.f32.mrb[41].mxu0 }
 0xb24   : > { %v2520_v19 = vpop.f32.mrb[42].mxu0  ;;  %v2665_v29 = vpop.f32.mrb[40].mxu1 }
 0xb25   : > { %v5431_v39 = vadd.f32 %v2665_v29, %v2517_v13  ;;  %v2522_v35 = vpop.f32.mrb[43].mxu0  ;;  %v2667_v56 = vpop.f32.mrb[41].mxu1 }
 0xb26   : > { %v2668_v57 = vpop.f32.mrb[42].mxu1 }
 0xb27   : > { %v5433_v0 = vadd.f32 %v2668_v57, %v2520_v19  ;;  %v2670_v58 = vpop.f32.mrb[43].mxu1 }
 0xb3a   : > { %v2809_v61 = vpop.f32.mrb[44].mxu0 }
 0xb3b   : > { %v2840_v62 = vadd.f32 %v2809_v61, %v2642_v26  ;;  %v2811_v63 = vpop.f32.mrb[45].mxu0 }
 0xb3c   : > { %v2812_v1 = vpop.f32.mrb[46].mxu0 }
 0xb3d   : > { %v2853_v2 = vadd.f32 %v5436_v60, %v2840_v62  ;;  %v2841_v3 = vadd.f32 %v2812_v1, %v2645_v34  ;;  %v2814_v4 = vpop.f32.mrb[47].mxu0 }
 0xb3f   : > { %vm2861_vm2 = vcmp.ge.f32.partialorder %v2853_v2, 0.0  ;;  %v2869_v30 = vmul.f32 0.02, %v2853_v2  ;;  %v2854_v6 = vadd.f32 %v5436_v60, %v2841_v3 }
 0xb41   : > { %v2877_v11 = vsel %vm2861_vm2, %v2853_v2, %v2869_v30  ;;  %vm2862_vm0 = vcmp.ge.f32.partialorder %v2854_v6, 0.0  ;;  %v2870_v15 = vmul.f32 0.02, %v2854_v6 }
 0xb42   : > { %v2889_v16 = vmul.f32 %v5440_v5, %v2877_v11  ;;  %v2817_v40 = vpop.f32.mrb[48].mxu0 }
 0xb43   : > { %v2878_v38 = vsel %vm2862_vm0, %v2854_v6, %v2870_v15  ;;  %v2842_v42 = vadd.f32 %v2817_v40, %v2650_v44  ;;  %v2819_v48 = vpop.f32.mrb[49].mxu0  ;;  %v4240_v15 = vld [vmem:[#allocation10] sm:$0xff]  }
 0xb44   : > { %v2890_v46 = vmul.f32 %v5440_v5, %v2878_v38  ;;  %v2820_v47 = vpop.f32.mrb[50].mxu0  ;;  %v2901_v18 = vadd.f32 %v5444_v7, %v2889_v16  ;;  %3992 = vmatprep.subr.bf16.mxu1 %v4240_v15  ;;  %v3785_v16 = vld [vmem:[%s5620_s20] ss:$0 sm:$0xff] }
 0xb45   : > { %v2855_v21 = vadd.f32 %v5436_v60, %v2842_v42  ;;  %v2843_v25 = vadd.f32 %v2820_v47, %v2653_v28  ;;  %v2822_v26 = vpop.f32.mrb[51].mxu0 }
 0xb46   : > { %v2902_v27 = vadd.f32 %v5444_v7, %v2890_v46 }
 0xb47   : > { %vm2863_vm5 = vcmp.ge.f32.partialorder %v2855_v21, 0.0  ;;  %v2871_v31 = vmul.f32 0.02, %v2855_v21  ;;  %v2856_v32 = vadd.f32 %v5436_v60, %v2843_v25 }
 0xb48   : > { %v2909_v34 = vpack.c.bf16 %v2902_v27, %v2901_v18 }
 0xb49   : > { %v2879_v36 = vsel %vm2863_vm5, %v2855_v21, %v2871_v31  ;;  %vm2864_vm6 = vcmp.ge.f32.partialorder %v2856_v32, 0.0  ;;  %v2872_v37 = vmul.f32 0.02, %v2856_v32 }
 0xb4a   : > { %v2891_v41 = vmul.f32 %v5440_v5, %v2879_v36  ;;  %v2825_v49 = vpop.f32.mrb[52].mxu0  ;;  %3984 = vmatprep.mubr.msk.bf16.mxu1 %vm1023_vm3, %v2909_v34 }
 0xb4b   : > { %v2880_v43 = vsel %vm2864_vm6, %v2856_v32, %v2872_v37  ;;  %v2844_v44 = vadd.f32 %v2825_v49, %v2658_v22  ;;  %v2827_v45 = vpop.f32.mrb[53].mxu0  ;;  %v3019_v49 = vld [vmem:[#allocation12] sm:$0x7] }
 0xb4c   : > { %v2903_v50 = vadd.f32 %v5444_v7, %v2891_v41  ;;  %v2892_v51 = vmul.f32 %v5440_v5, %v2880_v43  ;;  %v2828_v28 = vpop.f32.mrb[54].mxu0  ;;  %v3023_v43 = vrot.slane %v3019_v49, %v5147_v14 }
 0xb4d   : > { %v2857_v33 = vadd.f32 %v5436_v60, %v2844_v44  ;;  %v2845_v52 = vadd.f32 %v2828_v28, %v2661_v10  ;;  %v2830_v53 = vpop.f32.mrb[55].mxu0 }
 0xb4e   : > { %v2904_v8 = vadd.f32 %v5444_v7, %v2892_v51  ;;  %v5483_v51 = vrot.slane %v3019_v49, %v5231_v12 }
 0xb4f   : > { %vm2865_vm7 = vcmp.ge.f32.partialorder %v2857_v33, 0.0  ;;  %v2873_v9 = vmul.f32 0.02, %v2857_v33  ;;  %v2858_v23 = vadd.f32 %v5436_v60, %v2845_v52 }
 0xb50   : > { %v2910_v54 = vpack.c.bf16 %v2904_v8, %v2903_v50 }
 0xb51   : > { %v2881_v55 = vsel %vm2865_vm7, %v2857_v33, %v2873_v9  ;;  %vm2866_vm8 = vcmp.ge.f32.partialorder %v2858_v23, 0.0  ;;  %v2874_v22 = vmul.f32 0.02, %v2858_v23  ;;  %v3146_v9 = vrot.slane %v3019_v49, %v5235_v20 }
 0xb52   : > { %v2893_v24 = vmul.f32 %v5440_v5, %v2881_v55  ;;  %v2833_v13 = vpop.f32.mrb[56].mxu0  ;;  %3985 = vmatmul.mubr.msk.bf16.vlgmr.msra.gmra.mrb[44].mxu1 %vm1023_vm3, %v2910_v54 }
 0xb53   : > { %v2882_v17 = vsel %vm2866_vm8, %v2858_v23, %v2874_v22  ;;  %v2846_v19 = vadd.f32 %v2833_v13, %v5431_v39  ;;  %v2835_v10 = vpop.f32.mrb[57].mxu0  ;;  %3993 = vmatpush3.bf16.msra.mxu1 %v4240_v15 }
 0xb54   : > { %v2894_v29 = vmul.f32 %v5440_v5, %v2882_v17  ;;  %v2836_v35 = vpop.f32.mrb[58].mxu0  ;;  %v2905_v56 = vadd.f32 %v5444_v7, %v2893_v24 }
 0xb55   : > { %v2859_v57 = vadd.f32 %v5436_v60, %v2846_v19  ;;  %v2847_v58 = vadd.f32 %v2836_v35, %v5433_v0  ;;  %v2838_v59 = vpop.f32.mrb[59].mxu0 }
 0xb56   : > { %v2906_v61 = vadd.f32 %v5444_v7, %v2894_v29 }
 0xb57   : > { %vm2867_vm10 = vcmp.ge.f32.partialorder %v2859_v57, 0.0  ;;  %v2875_v62 = vmul.f32 0.02, %v2859_v57  ;;  %v2860_v63 = vadd.f32 %v5436_v60, %v2847_v58 }
 0xb58   : > { %v2911_v1 = vpack.c.bf16 %v2906_v61, %v2905_v56 }
 0xb59   : > { %v2883_v2 = vsel %vm2867_vm10, %v2859_v57, %v2875_v62  ;;  %vm2868_vm12 = vcmp.ge.f32.partialorder %v2860_v63, 0.0  ;;  %v2876_v39 = vmul.f32 0.02, %v2860_v63 }
 0xb5a   : > { %v2895_v3 = vmul.f32 %v5440_v5, %v2883_v2  ;;  %3988 = vmatprep.mubr.msk.bf16.mxu1 %vm1023_vm3, %v2911_v1 }
 0xb5b   : > { %v2884_v4 = vsel %vm2868_vm12, %v2860_v63, %v2876_v39 }
 0xb5c   : > { %v2896_v30 = vmul.f32 %v5440_v5, %v2884_v4  ;;  %v2907_v0 = vadd.f32 %v5444_v7, %v2895_v3 }
 0xb5e   : > { %v2908_v6 = vadd.f32 %v5444_v7, %v2896_v30 }
 0xb60   : > { %v2912_v11 = vpack.c.bf16 %v2908_v6, %v2907_v0 }
 0xb62   : > { %3989 = vmatmul.mubr.msk.bf16.gmra.mrb[48].mxu1 %vm1023_vm3, %v2912_v11 }
 0xc25   : > { %v3986_v60 = vpop.f32.mrb[44].mxu1 }
 0xc26   : > { %v2982_v40 = vpop.f32.mrb[45].mxu1  ;;  %v2991_v42 = vadd.f32 %v3986_v60, %v3785_v16 }
 0xc27   : > { %v3987_v38 = vpop.f32.mrb[46].mxu1  ;;  %v2983_v46 = vadd.f32 %v3785_v16, %v2982_v40 }
 0xc28   : > { %v2994_v48 = vadd.f32 %v3987_v38, %v3785_v16  ;;  %v2985_v5 = vpop.f32.mrb[47].mxu1 }
 0xc29   : > { %v2986_v47 = vadd.f32 %v3785_v16, %v2985_v5 }
 0xc2a   : > { %v3014_v18 = vpack.c.bf16 %v2994_v48, %v2991_v42 }
 0xc2b   : > { %v3013_v7 = vpack.c.bf16 %v2986_v47, %v2983_v46 }
 0xc2d   : > { %3994 = vmatprep.mubr.msk.bf16.mxu1 %vm712_vm1, %v3013_v7 }
 0xc2e   : > { %3995 = vmatmul.mubr.msk.bf16.vlgmr.msra.gmra.mrb[52].mxu1 %vm712_vm1, %v3014_v18 }
 0xc35   : > { %v3990_v21 = vpop.f32.mrb[48].mxu1 }
 0xc36   : > { %v2998_v25 = vpop.f32.mrb[49].mxu1  ;;  %v3007_v27 = vadd.f32 %v3990_v21, %v3785_v16 }
 0xc37   : > { %v3991_v26 = vpop.f32.mrb[50].mxu1  ;;  %v2999_v34 = vadd.f32 %v3785_v16, %v2998_v25 }
 0xc38   : > { %v3010_v31 = vadd.f32 %v3991_v26, %v3785_v16  ;;  %v3001_v32 = vpop.f32.mrb[51].mxu1 }
 0xc39   : > { %v3002_v36 = vadd.f32 %v3785_v16, %v3001_v32 }
 0xc3a   : > { %v3016_v37 = vpack.c.bf16 %v3010_v31, %v3007_v27 }
 0xc3b   : > { %v3015_v41 = vpack.c.bf16 %v3002_v36, %v2999_v34 }
 0xc3d   : > { %3998 = vmatprep.mubr.msk.bf16.mxu1 %vm712_vm1, %v3015_v41 }
 0xc3e   : > { %3999 = vmatmul.mubr.msk.bf16.gmra.mrb[56].mxu1 %vm712_vm1, %v3016_v37 }
 0xd01   : > { %v3996_v44 = vpop.f32.mrb[52].mxu1 }
 0xd02   : > { %v3085_v45 = vadd.f32 %v3996_v44, %v3023_v43  ;;  %v3076_v50 = vpop.f32.mrb[53].mxu1 }
 0xd03   : > { %v3077_v28 = vadd.f32 %v3076_v50, %v3023_v43  ;;  %v3997_v33 = vpop.f32.mrb[54].mxu1 }
 0xd04   : > { %vm3109_vm3 = vcmp.ge.f32.partialorder %v3085_v45, 0.0  ;;  %v3117_v52 = vmul.f32 0.02, %v3085_v45  ;;  %v3088_v53 = vadd.f32 %v3997_v33, %v3023_v43  ;;  %v3079_v8 = vpop.f32.mrb[55].mxu1 }
 0xd05   : > { %vm3107_vm13 = vcmp.ge.f32.partialorder %v3077_v28, 0.0  ;;  %v3115_v23 = vmul.f32 0.02, %v3077_v28  ;;  %v3080_v54 = vadd.f32 %v3079_v8, %v3023_v43 }
 0xd06   : > { %v3125_v55 = vsel %vm3109_vm3, %v3085_v45, %v3117_v52  ;;  %vm3110_vm1 = vcmp.ge.f32.partialorder %v3088_v53, 0.0  ;;  %v3118_v14 = vmul.f32 0.02, %v3088_v53 }
 0xd07   : > { %v3123_v22 = vsel %vm3107_vm13, %v3077_v28, %v3115_v23  ;;  %vm3108_vm14 = vcmp.ge.f32.partialorder %v3080_v54, 0.0  ;;  %v3116_v24 = vmul.f32 0.02, %v3080_v54  ;;  %v3137_v12 = vmul.f32 %v5483_v51, %v3125_v55 }
 0xd08   : > { %v3126_v13 = vsel %vm3110_vm1, %v3088_v53, %v3118_v14  ;;  %v3135_v17 = vmul.f32 %v5483_v51, %v3123_v22 }
 0xd09   : > { %v3124_v19 = vsel %vm3108_vm14, %v3080_v54, %v3116_v24  ;;  %v3149_v10 = vadd.f32 %v3146_v9, %v3137_v12  ;;  %v3138_v29 = vmul.f32 %v5483_v51, %v3126_v13 }
 0xd0a   : > { %v3147_v20 = vadd.f32 %v3146_v9, %v3135_v17  ;;  %v3136_v35 = vmul.f32 %v5483_v51, %v3124_v19 }
 0xd0b   : > { %v3157_v56 = vmul.f32 3.0, %v3149_v10  ;;  %v3150_v57 = vadd.f32 %v3146_v9, %v3138_v29 }
 0xd0c   : > { %v3148_v58 = vadd.f32 %v3146_v9, %v3136_v35  ;;  %v5492_v63 = vmul.f32 3.0, %v3147_v20 }
 0xd0d   : > { %v3170_v59 = vsel %vm3163_vm9, %v3157_v56, -inf  ;;  %v3158_v61 = vmul.f32 3.0, %v3150_v57 }
 0xd0e   : > { %3171 = vmax.xlane.f32.xlu0 %v3170_v59  ;;  %v5494_v3 = vmul.f32 3.0, %v3148_v58  ;;  %v3164_v0 = vsel %vm3163_vm9, %v5492_v63, -inf }
 0xd0f   : > { %v3173_v62 = vsel %vm3163_vm9, %v3158_v61, -inf }
 0xd10   : > { %3174 = vmax.xlane.f32.xlu1 %v3173_v62  ;;  %v3167_v42 = vsel %vm3163_vm9, %v5494_v3, -inf }
 0xd11   : > { %v4000_v1 = vpop.f32.mrb[56].mxu1 }
 0xd12   : > { %v3101_v2 = vadd.f32 %v4000_v1, %v3023_v43  ;;  %v3092_v39 = vpop.f32.mrb[57].mxu1 }
 0xd13   : > { %v3093_v4 = vadd.f32 %v3092_v39, %v3023_v43  ;;  %v4001_v30 = vpop.f32.mrb[58].mxu1 }
 0xd14   : > { %vm3113_vm11 = vcmp.ge.f32.partialorder %v3101_v2, 0.0  ;;  %v3121_v6 = vmul.f32 0.02, %v3101_v2  ;;  %v3104_v11 = vadd.f32 %v4001_v30, %v3023_v43  ;;  %3165 = vmax.xlane.f32.xlu1 %v3164_v0  ;;  %v3095_v15 = vpop.f32.mrb[59].mxu1 }
 0xd15   : > { %vm3111_vm15 = vcmp.ge.f32.partialorder %v3093_v4, 0.0  ;;  %v3119_v60 = vmul.f32 0.02, %v3093_v4  ;;  %v3096_v16 = vadd.f32 %v3095_v15, %v3023_v43  ;;  %v3252_v15 = vld [vmem:[#allocation13] sm:$0xf] }
 0xd16   : > { %v3129_v40 = vsel %vm3113_vm11, %v3101_v2, %v3121_v6  ;;  %vm3114_vm2 = vcmp.ge.f32.partialorder %v3104_v11, 0.0  ;;  %v3122_v38 = vmul.f32 0.02, %v3104_v11  ;;  %4002 = vmatprep.subr.msk.mxu0 %vm2303_vm4, %v3252_v15  ;;  %4016 = vmatprep.subr.msk.mxu1 %vm2303_vm4, %v3252_v15 }
 0xd17   : > { %v3127_v48 = vsel %vm3111_vm15, %v3093_v4, %v3119_v60  ;;  %vm3112_vm0 = vcmp.ge.f32.partialorder %v3096_v16, 0.0  ;;  %v3120_v5 = vmul.f32 0.02, %v3096_v16  ;;  %v3141_v46 = vmul.f32 %v5483_v51, %v3129_v40  ;;  %4003 = vmatpush3.msk.msra.mxu0 %vm2303_vm4, %v3252_v15  ;;  %4017 = vmatpush3.msk.msra.mxu1 %vm2303_vm4, %v3252_v15 }
 0xd18   : > { %v3130_v47 = vsel %vm3114_vm2, %v3104_v11, %v3122_v38  ;;  %3168 = vmax.xlane.f32.xlu1 %v3167_v42  ;;  %v3139_v18 = vmul.f32 %v5483_v51, %v3127_v48  ;;  %vm3425_vm4 = vcmask 162816  }
 0xd19   : > { %v3128_v7 = vsel %vm3112_vm0, %v3096_v16, %v3120_v5  ;;  %v3153_v21 = vadd.f32 %v3146_v9, %v3141_v46  ;;  %v3142_v25 = vmul.f32 %v5483_v51, %v3130_v47 }
 0xd1a   : > { %v3151_v26 = vadd.f32 %v3146_v9, %v3139_v18  ;;  %v3140_v27 = vmul.f32 %v5483_v51, %v3128_v7 }
 0xd1b   : > { %v3161_v31 = vmul.f32 3.0, %v3153_v21  ;;  %v3154_v32 = vadd.f32 %v3146_v9, %v3142_v25 }
 0xd1c   : > { %v3152_v34 = vadd.f32 %v3146_v9, %v3140_v27  ;;  %v3159_v37 = vmul.f32 3.0, %v3151_v26 }
 0xd1d   : > { %v3182_v36 = vsel %vm3163_vm9, %v3161_v31, -inf  ;;  %v3162_v44 = vmul.f32 3.0, %v3154_v32 }
 0xd1e   : > { %3183 = vmax.xlane.f32.xlu0 %v3182_v36  ;;  %v3176_v41 = vsel %vm3163_vm9, %v3159_v37, -inf  ;;  %v3160_v49 = vmul.f32 3.0, %v3152_v34 }
 0xd1f   : > { %v3185_v45 = vsel %vm3163_vm9, %v3162_v44, -inf }
 0xd20   : > { %v3179_v43 = vsel %vm3163_vm9, %v3160_v49, -inf }
 0xd22   : > { %3177 = vmax.xlane.f32.xlu0 %v3176_v41 }
 0xd26   : > { %3180 = vmax.xlane.f32.xlu0 %v3179_v43 }
 0xd2a   : > { %3186 = vmax.xlane.f32.xlu0 %v3185_v45 }
 0xd9b   : > { %v3172_v50 = vpop.xlane.xlu0 %3171 }
 0xd9c   : > { %v3190_v51 = vsub.f32 %v3157_v56, %v3172_v50 }
 0xd9d   : > { %v3175_v28 = vpop.xlane.xlu1 %3174 }
 0xd9e   : > { %v3200_v33 = vmul.f32 1.442695, %v3190_v51  ;;  %v3191_v52 = vsub.f32 %v3158_v61, %v3175_v28 }
 0xda0   : > { %4245 = vpow2.f32 %v3200_v33  ;;  %v3202_v53 = vmul.f32 1.442695, %v3191_v52 }
 0xda1   : > { %v3166_v8 = vpop.xlane.xlu1 %3165 }
 0xda2   : > { %4247 = vpow2.f32 %v3202_v53  ;;  %v3188_v24 = vsub.f32 %v5492_v63, %v3166_v8 }
 0xda4   : > { %v3196_v10 = vmul.f32 1.442695, %v3188_v24 }
 0xda5   : > { %v3169_v13 = vpop.xlane.xlu1 %3168 }
 0xda6   : > { %v3189_v29 = vsub.f32 %v5494_v3, %v3169_v13 }
 0xda8   : > { %v3198_v57 = vmul.f32 1.442695, %v3189_v29 }
 0xdaa   : > { %v4246_v9 = vpop.eup %4245 }
 0xdab   : > { %v3184_v23 = vpop.xlane.xlu0 %3183  ;;  %v3218_v54 = vsel %vm3163_vm9, %v4246_v9, 0.0 }
 0xdac   : > { %v4248_v55 = vpop.eup %4247  ;;  %v3194_v14 = vsub.f32 %v3161_v31, %v3184_v23  ;;  %3219 = vadd.xlane.f32.xlu1 %v3218_v54 }
 0xdad   : > { %v3221_v22 = vsel %vm3163_vm9, %v4248_v55, 0.0 }
 0xdae   : > { %v3208_v12 = vmul.f32 1.442695, %v3194_v14  ;;  %3222 = vadd.xlane.f32.xlu0 %v3221_v22 }
 0xdaf   : > { %v3178_v17 = vpop.xlane.xlu0 %3177 }
 0xdb0   : > { %4249 = vpow2.f32 %v3208_v12  ;;  %v3192_v19 = vsub.f32 %v3159_v37, %v3178_v17 }
 0xdb2   : > { %v3204_v20 = vmul.f32 1.442695, %v3192_v19 }
 0xdb3   : > { %v3181_v35 = vpop.xlane.xlu0 %3180 }
 0xdb4   : > { %4251 = vpow2.f32 %v3204_v20  ;;  %v3193_v56 = vsub.f32 %v3160_v49, %v3181_v35 }
 0xdb5   : > { %4253 = vpow2.f32 %v3196_v10 }
 0xdb6   : > { %v3206_v58 = vmul.f32 1.442695, %v3193_v56 }
 0xdb7   : > { %v3187_v59 = vpop.xlane.xlu0 %3186 }
 0xdb8   : > { %4255 = vpow2.f32 %v3206_v58  ;;  %v3195_v61 = vsub.f32 %v3162_v44, %v3187_v59 }
 0xdb9   : > { %4257 = vpow2.f32 %v3198_v57 }
 0xdba   : > { %v4250_v62 = vpop.eup %4249  ;;  %v3210_v63 = vmul.f32 1.442695, %v3195_v61 }
 0xdbb   : > { %v3230_v1 = vsel %vm3163_vm9, %v4250_v62, 0.0 }
 0xdbc   : > { %4259 = vpow2.f32 %v3210_v63  ;;  %3231 = vadd.xlane.f32.xlu0 %v3230_v1 }
 0xdbe   : > { %v4252_v2 = vpop.eup %4251 }
 0xdbf   : > { %v3224_v39 = vsel %vm3163_vm9, %v4252_v2, 0.0  ;;  %v4254_v3 = vpop.eup %4253 }
 0xdc0   : > { %3225 = vadd.xlane.f32.xlu1 %v3224_v39  ;;  %v3212_v30 = vsel %vm3163_vm9, %v4254_v3, 0.0 }
 0xdc2   : > { %v4256_v4 = vpop.eup %4255 }
 0xdc3   : > { %v3227_v0 = vsel %vm3163_vm9, %v4256_v4, 0.0  ;;  %v4258_v6 = vpop.eup %4257 }
 0xdc4   : > { %3213 = vadd.xlane.f32.xlu1 %v3212_v30  ;;  %3228 = vadd.xlane.f32.xlu0 %v3227_v0  ;;  %v3215_v60 = vsel %vm3163_vm9, %v4258_v6, 0.0 }
 0xdc6   : > { %v4260_v11 = vpop.eup %4259 }
 0xdc7   : > { %v3233_v16 = vsel %vm3163_vm9, %v4260_v11, 0.0 }
 0xdc8   : > { %3216 = vadd.xlane.f32.xlu1 %v3215_v60  ;;  %3234 = vadd.xlane.f32.xlu0 %v3233_v16 }
 0xe39   : > { %v3220_v40 = vpop.xlane.xlu1 %3219 }
 0xe3a   : > { %4261 = vrcp.f32 %v3220_v40 }
 0xe3b   : > { %v3223_v38 = vpop.xlane.xlu0 %3222 }
 0xe3c   : > { %4263 = vrcp.f32 %v3223_v38 }
 0xe44   : > { %v4262_v42 = vpop.eup %4261 }
 0xe45   : > { %v3241_v48 = vmul.f32 %v4262_v42, %v4246_v9 }
 0xe46   : > { %v4264_v5 = vpop.eup %4263 }
 0xe47   : > { %v3243_v46 = vmul.f32 %v4264_v5, %v4248_v55  ;;  %4007 = vmatprep.mubr.msk.f32.mxu1 %vm3163_vm9, %v3241_v48 }
 0xe49   : > { %4008 = vmatmul.mubr.msk.f32.vlgmr.msra.gmra.mrb[60].mxu1 %vm3163_vm9, %v3243_v46  ;;  %v3232_v47 = vpop.xlane.xlu0 %3231 }
 0xe4d   : > { %v3226_v18 = vpop.xlane.xlu1 %3225 }
 0xe4e   : > { %4265 = vrcp.f32 %v3226_v18 }
 0xe4f   : > { %4267 = vrcp.f32 %v3232_v47 }
 0xe51   : > { %v3214_v7 = vpop.xlane.xlu1 %3213  ;;  %v3229_v21 = vpop.xlane.xlu0 %3228 }
 0xe52   : > { %4269 = vrcp.f32 %v3214_v7 }
 0xe53   : > { %4271 = vrcp.f32 %v3229_v21 }
 0xe55   : > { %v3217_v25 = vpop.xlane.xlu1 %3216  ;;  %v3235_v26 = vpop.xlane.xlu0 %3234 }
 0xe56   : > { %4273 = vrcp.f32 %v3217_v25 }
 0xe57   : > { %4275 = vrcp.f32 %v3235_v26 }
 0xe58   : > { %v4266_v27 = vpop.eup %4265 }
 0xe59   : > { %v3245_v31 = vmul.f32 %v4266_v27, %v4252_v2  ;;  %v4268_v32 = vpop.eup %4267 }
 0xe5a   : > { %v3249_v49 = vmul.f32 %v4268_v32, %v4250_v62 }
 0xe5b   : > { %4010 = vmatprep.mubr.msk.f32.mxu1 %vm3163_vm9, %v3245_v31 }
 0xe5c   : > { %v4270_v34 = vpop.eup %4269 }
 0xe5d   : > { %v4272_v36 = vpop.eup %4271  ;;  %v3237_v37 = vmul.f32 %v4270_v34, %v4254_v3 }
 0xe5e   : > { %v3247_v41 = vmul.f32 %v4272_v36, %v4256_v4 }
 0xe5f   : > { %4004 = vmatprep.mubr.msk.f32.mxu0 %vm3163_vm9, %v3237_v37 }
 0xe60   : > { %v4274_v43 = vpop.eup %4273  ;;  %4011 = vmatmul.mubr.msk.f32.gmra.mrb[62].mxu1 %vm3163_vm9, %v3247_v41 }
 0xe61   : > { %v4276_v44 = vpop.eup %4275  ;;  %v3239_v45 = vmul.f32 %v4274_v43, %v4258_v6  ;;  %4013 = vmatprep.mubr.msk.f32.mxu1 %vm3163_vm9, %v3249_v49 }
 0xe62   : > { %v3251_v50 = vmul.f32 %v4276_v44, %v4260_v11 }
 0xe63   : > { %4005 = vmatmul.mubr.msk.f32.vlgmr.msra.gmra.mrb[60].mxu0 %vm3163_vm9, %v3239_v45 }
 0xe64   : > { %4014 = vmatmul.mubr.msk.f32.gmra.mrb[64].mxu1 %vm3163_vm9, %v3251_v50 }
 0xf1c   : > { %v4009_v51 = vpop.f32.mrb[60].mxu1 }
 0xf1d   : > { %3399 = vrot.lane.b32.xlu1 %v4009_v51, %s4545_s21  ;;  %v3356_v28 = vpop.f32.mrb[61].mxu1 }
 0xf21   : > { %3397 = vrot.lane.b32.xlu1 %v3356_v28, %s4545_s21 }
 0xf33   : > { %v4012_v33 = vpop.f32.mrb[62].mxu1 }
 0xf34   : > { %v3366_v52 = vpop.f32.mrb[63].mxu1 }
 0xf36   : > { %v4006_v53 = vpop.f32.mrb[60].mxu0 }
 0xf37   : > { %v4015_v8 = vpop.f32.mrb[64].mxu1  ;;  %v3346_v9 = vpop.f32.mrb[61].mxu0  ;;  %3395 = vrot.lane.b32.xlu0 %v4006_v53, %s4545_s21 }
 0xf38   : > { %v3376_v23 = vpop.f32.mrb[65].mxu1  ;;  %3393 = vrot.lane.b32.xlu1 %v3346_v9, %s4545_s21 }
 0xf3b   : > { %3401 = vrot.lane.b32.xlu0 %v3366_v52, %s4545_s21 }
 0xf3c   : > { %3403 = vrot.lane.b32.xlu1 %v4012_v33, %s4545_s21 }
 0xf3f   : > { %3405 = vrot.lane.b32.xlu0 %v3376_v23, %s4545_s21 }
 0xf40   : > { %3407 = vrot.lane.b32.xlu1 %v4015_v8, %s4545_s21 }
 0xf8f   : > { %v3400_v54 = vpop.permute.xlu1 %3399 }
 0xf90   : > { %v3420_v55 = vsel %vm3163_vm9, %v3243_v46, %v3400_v54 }
 0xf91   : > { %v3429_v14 = vsel %vm3425_vm4, %v3420_v55, 0.0 }
 0xf92   : > { %3437 = vst [vmem:[%s5534_s22 + $0x18] sm:$0xff] %v3429_v14 }
 0xf93   : > { %v3398_v22 = vpop.permute.xlu1 %3397 }
 0xf94   : > { %v3419_v24 = vsel %vm3163_vm9, %v3241_v48, %v3398_v22 }
 0xf95   : > { %v3428_v12 = vsel %vm3425_vm4, %v3419_v24, 0.0 }
 0xf96   : > { %3436 = vst [vmem:[%s5534_s22 + $0x10] sm:$0xff] %v3428_v12 }
 0xfa9   : > { %v3396_v13 = vpop.permute.xlu0 %3395 }
 0xfaa   : > { %v3418_v17 = vsel %vm3163_vm9, %v3239_v45, %v3396_v13  ;;  %v3394_v19 = vpop.permute.xlu1 %3393 }
 0xfab   : > { %v3427_v10 = vsel %vm3425_vm4, %v3418_v17, 0.0  ;;  %v3417_v29 = vsel %vm3163_vm9, %v3237_v37, %v3394_v19 }
 0xfac   : > { %3435 = vst [vmem:[%s5534_s22 + $0x8] sm:$0xff] %v3427_v10  ;;  %v3426_v20 = vsel %vm3425_vm4, %v3417_v29, 0.0 }
 0xfad   : > { %3434 = vst [vmem:[%s5534_s22] sm:$0xff] %v3426_v20  ;;  %v3402_v35 = vpop.permute.xlu0 %3401 }
 0xfae   : > { %v3421_v56 = vsel %vm3163_vm9, %v3245_v31, %v3402_v35  ;;  %v3404_v57 = vpop.permute.xlu1 %3403 }
 0xfaf   : > { %v3430_v58 = vsel %vm3425_vm4, %v3421_v56, 0.0  ;;  %v3422_v59 = vsel %vm3163_vm9, %v3247_v41, %v3404_v57 }
 0xfb0   : > { %3438 = vst [vmem:[%s5534_s22 + $0x20] sm:$0xff] %v3430_v58  ;;  %v3431_v61 = vsel %vm3425_vm4, %v3422_v59, 0.0 }
 0xfb1   : > { %3439 = vst [vmem:[%s5534_s22 + $0x28] sm:$0xff] %v3431_v61  ;;  %v3406_v62 = vpop.permute.xlu0 %3405 }
 0xfb2   : > { %v3423_v63 = vsel %vm3163_vm9, %v3249_v49, %v3406_v62  ;;  %v3408_v1 = vpop.permute.xlu1 %3407 }
 0xfb3   : > { %v3432_v2 = vsel %vm3425_vm4, %v3423_v63, 0.0  ;;  %v3424_v39 = vsel %vm3163_vm9, %v3251_v50, %v3408_v1 }
 0xfb4   : > { %3440 = vst [vmem:[%s5534_s22 + $0x30] sm:$0xff] %v3432_v2  ;;  %v3433_v3 = vsel %vm3425_vm4, %v3424_v39, 0.0 }
 0xfb5   : > { %3441 = vst [vmem:[%s5534_s22 + $0x38] sm:$0xff] %v3433_v3 }
 0xfb6 PF: > { %s5622_s28 = sld [smem:[#allocation20_spill]] }
 0xfbc   : > { %s33_s27 = sadd.s32 1, %s5622_s28  }
 0xfbd   : > { %p30_p11 = scmp.ge.s32.totalorder %s33_s27, 4  }
 0xfbf   :  { %32 = sbr.rel (!%p30_p11) target bundleno = 13 (0xd), region = 161 }
 0xfc6   :  { %3463 = vsyncpa [#allocation3], 1 }
 0xfc7   :  { %3465 = vsyncpa [#allocation3 + $0x1], 1 }
 0xfc8   :  { %3466 = vsyncpa [#allocation5], 1 }
 0xfc9   :  { %3467 = vsyncpa [#allocation8], 1 }
 0xfca   :  { %3468 = vsyncpa [#allocation11], 1 }
 0xfcb   :  { %3469 = vsyncpa [#allocation14], 1 }

</bundles_post_ra>
